<compile_context>
chip_gen: v6e
topology: v6e:2x2x1
jax: 0.10.0
libtpu: 0.0.40
codegen_flags: <defaults>
</compile_context>

<pallas_src>
import functools

import jax
import jax.numpy as jnp
from jax.experimental import pallas as pl
from jax.experimental.pallas import tpu as pltpu

_LANE = 128
_MAX_TV = 4096                      # cap on vertex tile width (lanes)
_VMEM_BUDGET = 16 * 1024 * 1024     # conservative per-step working-set target


def _round_up(x, m):
    return (x + m - 1) // m * m


def _pick_tv(tb, num_classes, logits_itemsize, tgt_itemsize, num_vertices,
             max_tv):
    """Widest multiple-of-128 vertex tile whose working set fits the budget."""
    # double-buffered logits + target blocks, ~6 full-width f32 temporaries in
    # the per-class math, plus the small per-vertex f32 vectors/accumulators.
    per_lane = tb * (num_classes * (2 * logits_itemsize + 2 * tgt_itemsize
                                    + 6 * 4)
                     + 12 * 4)
    tv = (_VMEM_BUDGET // per_lane) // _LANE * _LANE
    tv = max(_LANE, min(max_tv, tv))
    return min(tv, _round_up(num_vertices, _LANE))


def _loss_kernel(pw_ref, cont_ref, logits_ref, tgt_ref,
                 bce_ref, sem_ref, cnt_ref, *,
                 batch, num_vertices, tiles_per_chunk):
    """One (batch-block, vertex-chunk, vertex-tile) grid step.

    pw_ref     : (1, TV)      f32        BCE pos_weight (broadcast over batch)
    cont_ref   : (TB, TV)     bf16/f32   any-contact logits
    logits_ref : (TB, C, TV)  bf16/f32   per-class logits
    tgt_ref    : (TB, C, TV)  int8/...   {0,1} one-hot target
    out refs   : (TB, TV)     f32        partial sums, accumulated over the
                                         vertex-tile (arbitrary) grid axis.
    """
    tb, tv = cont_ref.shape

    @pl.when(pl.program_id(2) == 0)
    def _():
        bce_ref[...] = jnp.zeros_like(bce_ref)
        sem_ref[...] = jnp.zeros_like(sem_ref)
        cnt_ref[...] = jnp.zeros_like(cnt_ref)

    # Global (batch-row, vertex) index of every element in this tile.  Blocks
    # may overhang the unpadded arrays (no wrapper jnp.pad); overhang elements
    # hold unspecified bits and are masked out.  Duplicate tiles produced by
    # the clamped index_map land entirely past num_vertices -> contribute 0.
    vtile = pl.program_id(1) * tiles_per_chunk + pl.program_id(2)
    row0 = pl.program_id(0) * tb
    col0 = vtile * tv
    row = row0 + jax.lax.broadcasted_iota(jnp.int32, (tb, tv), 0)
    col = col0 + jax.lax.broadcasted_iota(jnp.int32, (tb, tv), 1)
    valid = (row < batch) & (col < num_vertices)                     # (TB, TV)

    shape3 = logits_ref.shape
    row3 = row0 + jax.lax.broadcasted_iota(jnp.int32, shape3, 0)
    col3 = col0 + jax.lax.broadcasted_iota(jnp.int32, shape3, 2)
    valid3 = (row3 < batch) & (col3 < num_vertices)                  # (TB, C, TV)

    # Sanitize BEFORE the transcendentals so overhang garbage can't make inf.
    x = jnp.where(valid, cont_ref[...].astype(jnp.float32), 0.0)     # (TB, TV)
    logits = jnp.where(valid3, logits_ref[...].astype(jnp.float32), 0.0)
    tgt = tgt_ref[...].astype(jnp.float32)                           # (TB, C, TV)

    t_sum = jnp.sum(tgt, axis=1)                # 1.0 on contact vertices
    y_any = t_sum > 0.0                         # (TB, TV) bool

    # ---- binary (any-contact) BCE with logits, pos_weight on positives ----
    #   y=1 : pos_weight * softplus(-x)      y=0 : softplus(x) = x + softplus(-x)
    sp_neg = jax.nn.softplus(-x)
    pw = pw_ref[...]                                                  # (1, TV)
    bce = jnp.where(y_any, pw * sp_neg, x + sp_neg)
    bce_ref[...] += jnp.where(valid, bce, 0.0)

    # ---- per-class cross entropy with a dense (one-hot) target -------------
    #   ce = sum_c t_c * (logsumexp_c(logits) - logits_c)
    m = jnp.max(logits, axis=1, keepdims=True)                        # (TB,1,TV)
    lse = m[:, 0, :] + jnp.log(jnp.sum(jnp.exp(logits - m), axis=1))  # (TB, TV)
    picked = jnp.sum(tgt * logits, axis=1)                            # (TB, TV)
    sem_ref[...] += jnp.where(valid, t_sum * lse - picked, 0.0)
    cnt_ref[...] += jnp.where(valid & y_any, 1.0, 0.0)


def multi_class_contact_loss(cont_pred, vertex_obj_pred, target, pos_weight,
                             contact_weight=1.0, class_weight=0.5,
                             dist_weight=0.08, max_tv=_MAX_TV):
    """Forward pass of MultiClassContactLoss.

    cont_pred       [B, V]    raw any-contact logits (bf16/f32)
    vertex_obj_pred [B, C, V] raw per-class logits   (bf16/f32)
    target          [B, C, V] {0,1} one-hot; a narrow dtype (int8/uint8) is
                              preferred -- it is streamed through the kernel.
    pos_weight      [V]       BCEWithLogits pos_weight
    """
    B, C, V = vertex_obj_pred.shape
    assert cont_pred.shape == (B, V)
    assert target.shape == (B, C, V)
    assert pos_weight.shape == (V,)

    max_tv = max(_LANE, (max_tv // _LANE) * _LANE)
    tb = min(8, B)                         # batch rows per block (sublane fill)
    nb = pl.cdiv(B, tb)
    tv = _pick_tv(tb, C, vertex_obj_pred.dtype.itemsize,
                  target.dtype.itemsize, V, max_tv)
    n_tiles = pl.cdiv(V, tv)
    nchunk = 2 if n_tiles >= 2 else 1      # parallel vertex chunks (v7x 2nd TC)
    nt = pl.cdiv(n_tiles, nchunk)          # vertex tiles per chunk

    pw = pos_weight.reshape(1, V).astype(jnp.float32)

    # Clamp so overflow steps (nchunk * nt > n_tiles) re-read an in-bounds
    # tile; the kernel masks them to zero via the *unclamped* vertex index.
    def _vt(c, t):
        return jnp.minimum(c * nt + t, n_tiles - 1)

    kernel = functools.partial(_loss_kernel, batch=B, num_vertices=V,
                               tiles_per_chunk=nt)

    nbytes = lambda a: int(a.size) * a.dtype.itemsize
    out_rows, out_cols = nb * tb, nchunk * tv
    cost = pl.CostEstimate(
        flops=int(B * V * (8 * C + 24)),
        transcendentals=int(B * V * (C + 3)),
        bytes_accessed=nbytes(cont_pred) + nbytes(vertex_obj_pred)
                       + nbytes(target) + nbytes(pw)
                       + 3 * out_rows * out_cols * 4,
    )

    bce_part, sem_part, cnt_part = pl.pallas_call(
        kernel,
        grid=(nb, nchunk, nt),
        in_specs=[
            pl.BlockSpec((1, tv), lambda b, c, t: (0, _vt(c, t))),         # pos_weight
            pl.BlockSpec((tb, tv), lambda b, c, t: (b, _vt(c, t))),        # cont_pred
            pl.BlockSpec((tb, C, tv), lambda b, c, t: (b, 0, _vt(c, t))),  # logits
            pl.BlockSpec((tb, C, tv), lambda b, c, t: (b, 0, _vt(c, t))),  # target
        ],
        out_specs=[
            pl.BlockSpec((tb, tv), lambda b, c, t: (b, c)),                # bce partials
            pl.BlockSpec((tb, tv), lambda b, c, t: (b, c)),                # masked CE partials
            pl.BlockSpec((tb, tv), lambda b, c, t: (b, c)),                # contact counts
        ],
        out_shape=[
            jax.ShapeDtypeStruct((out_rows, out_cols), jnp.float32),
            jax.ShapeDtypeStruct((out_rows, out_cols), jnp.float32),
            jax.ShapeDtypeStruct((out_rows, out_cols), jnp.float32),
        ],
        compiler_params=pltpu.CompilerParams(
            dimension_semantics=("parallel", "parallel", "arbitrary"),
            vmem_limit_bytes=32 * 1024 * 1024),
        cost_estimate=cost,
    )(pw, cont_pred, vertex_obj_pred, target)

    # Tiny final reductions / scalar arithmetic = glue, kept in plain JAX.
    binary_loss = jnp.sum(bce_part) / (B * V)
    cnt = jnp.sum(cnt_part)
    semantic_loss = jnp.where(cnt > 0.0,
                              jnp.sum(sem_part) / jnp.maximum(cnt, 1.0),
                              jnp.float32(0.0))

    # TODO(synk): det_error_metric needs the external SMPL geodesic distance
    # matrix and data-dependent boolean indexing; dist_loss stays 0 here (it is
    # detached / non-differentiable in the original module).
    dist_loss = jnp.float32(0.0)

    total = (contact_weight * binary_loss
             + class_weight * semantic_loss
             + dist_weight * dist_loss)
    return total, binary_loss, semantic_loss, dist_loss


def _reference(cont_pred, vertex_obj_pred, target, pos_weight,
               contact_weight=1.0, class_weight=0.5, dist_weight=0.08):
    x = cont_pred.astype(jnp.float32)
    logits = vertex_obj_pred.astype(jnp.float32)
    tgt = target.astype(jnp.float32)
    y_any = (jnp.max(tgt, axis=1) > 0).astype(jnp.float32)
    bce = (pos_weight[None, :] * y_any * jax.nn.softplus(-x)
           + (1.0 - y_any) * jax.nn.softplus(x))
    binary_loss = jnp.mean(bce)
    logp = jax.nn.log_softmax(logits, axis=1)
    ce = -jnp.sum(tgt * logp, axis=1)
    cnt = jnp.sum(y_any)
    semantic_loss = jnp.where(cnt > 0.0,
                              jnp.sum(ce * y_any) / jnp.maximum(cnt, 1.0),
                              0.0)
    dist_loss = jnp.float32(0.0)
    total = (contact_weight * binary_loss + class_weight * semantic_loss
             + dist_weight * dist_loss)
    return total, binary_loss, semantic_loss, dist_loss


if __name__ == "__main__":
    key = jax.random.PRNGKey(0)
    # Small shapes; V deliberately NOT a multiple of 128 and B > 8 so both the
    # lane-overhang and batch-block-overhang masking paths are exercised.
    B, C, V = 10, 8, 300

    k1, k2, k3, k4 = jax.random.split(key, 4)
    # Logit inputs in bf16 (half the HBM bytes); kernel up-casts to f32.
    cont_pred = jax.random.normal(k1, (B, V), dtype=jnp.float32).astype(jnp.bfloat16)
    vertex_obj_pred = jax.random.normal(
        k2, (B, C, V), dtype=jnp.float32).astype(jnp.bfloat16)

    # Deterministic synthetic {0,1} one-hot target, streamed as int8.
    cls = jax.random.randint(k3, (B, V), 0, C + 1)          # id == C => no contact
    contact = (cls < C).astype(jnp.float32)                                # [B, V]
    one_hot = jax.nn.one_hot(jnp.where(cls < C, cls, 0), C)                # [B, V, C]
    target = (jnp.transpose(one_hot, (0, 2, 1))
              * contact[:, None, :]).astype(jnp.int8)                      # [B, C, V]

    # Deterministic stand-in for pos_weights_damon.pt (per-vertex pos_weight).
    pos_weight = 1.0 + 4.0 * jax.random.uniform(k4, (V,), dtype=jnp.float32)

    ref = _reference(cont_pred, vertex_obj_pred, target, pos_weight)

    out = multi_class_contact_loss(cont_pred, vertex_obj_pred, target, pos_weight)
    out = jax.block_until_ready(out)
    for got, want in zip(out, ref):
        assert jnp.allclose(got, want, rtol=1e-4, atol=1e-5), (got, want)

    # Narrow-tile run: exercises multi-tile accumulation, the dual vertex-chunk
    # (v7x) axis and the clamped duplicate-tile path.
    out2 = multi_class_contact_loss(cont_pred, vertex_obj_pred, target,
                                    pos_weight, max_tv=128)
    out2 = jax.block_until_ready(out2)
    for got, want in zip(out2, ref):
        assert jnp.allclose(got, want, rtol=1e-4, atol=1e-5), (got, want)

    print("KERNEL_OK")
</pallas_src>

<mosaic_0001>
module attributes {stable_mosaic.version = 11 : i64} {
  func.func @_loss_kernel(%arg0: i32, %arg1: i32, %arg2: i32, %arg3: memref<1x384xf32, #tpu.memory_space<vmem>>, %arg4: memref<8x384xbf16, #tpu.memory_space<vmem>>, %arg5: memref<8x8x384xbf16, #tpu.memory_space<vmem>>, %arg6: memref<8x8x384xi8, #tpu.memory_space<vmem>>, %arg7: memref<8x384xf32, #tpu.memory_space<vmem>>, %arg8: memref<8x384xf32, #tpu.memory_space<vmem>>, %arg9: memref<8x384xf32, #tpu.memory_space<vmem>>) attributes {dimension_semantics = [#tpu.dimension_semantics<parallel>, #tpu.dimension_semantics<parallel>, #tpu.dimension_semantics<arbitrary>], iteration_bounds = array<i64: 2, 1, 1>, scalar_prefetch = 0 : i64, scratch_operands = 0 : i64, tpu.core_type = #tpu.core_type<tc>, window_params = [{transform_indices = @transform_0, window_bounds = array<i64: 1, 384>}, {transform_indices = @transform_1, window_bounds = array<i64: 8, 384>}, {transform_indices = @transform_2, window_bounds = array<i64: 8, 8, 384>}, {transform_indices = @transform_3, window_bounds = array<i64: 8, 8, 384>}, {transform_indices = @transform_4, window_bounds = array<i64: 8, 384>}, {transform_indices = @transform_5, window_bounds = array<i64: 8, 384>}, {transform_indices = @transform_6, window_bounds = array<i64: 8, 384>}]} {
    %c0_i32 = arith.constant 0 : i32
    %0 = arith.cmpi eq, %arg2, %c0_i32 : i32
    %1 = arith.extui %0 : i1 to i32
    %c0_i32_0 = arith.constant 0 : i32
    %2 = arith.cmpi ne, %1, %c0_i32_0 : i32
    scf.if %2 {
      %cst_37 = arith.constant 0.000000e+00 : f32
      %93 = vector.broadcast %cst_37 : f32 to vector<8x384xf32>
      %c0_38 = arith.constant 0 : index
      %c0_39 = arith.constant 0 : index
      %94 = vector.load %arg7[%c0_38, %c0_39] : memref<8x384xf32, #tpu.memory_space<vmem>>, vector<8x384xf32>
      tpu.vector_store %arg7[%c0_38, %c0_39], %93 {strides = array<i32>} : memref<8x384xf32, #tpu.memory_space<vmem>>, vector<8x384xf32>,
      %cst_40 = arith.constant 0.000000e+00 : f32
      %95 = vector.broadcast %cst_40 : f32 to vector<8x384xf32>
      %c0_41 = arith.constant 0 : index
      %c0_42 = arith.constant 0 : index
      %96 = vector.load %arg8[%c0_41, %c0_42] : memref<8x384xf32, #tpu.memory_space<vmem>>, vector<8x384xf32>
      tpu.vector_store %arg8[%c0_41, %c0_42], %95 {strides = array<i32>} : memref<8x384xf32, #tpu.memory_space<vmem>>, vector<8x384xf32>,
      %cst_43 = arith.constant 0.000000e+00 : f32
      %97 = vector.broadcast %cst_43 : f32 to vector<8x384xf32>
      %c0_44 = arith.constant 0 : index
      %c0_45 = arith.constant 0 : index
      %98 = vector.load %arg9[%c0_44, %c0_45] : memref<8x384xf32, #tpu.memory_space<vmem>>, vector<8x384xf32>
      tpu.vector_store %arg9[%c0_44, %c0_45], %97 {strides = array<i32>} : memref<8x384xf32, #tpu.memory_space<vmem>>, vector<8x384xf32>,
    } else {
    }
    %c1_i32 = arith.constant 1 : i32
    %3 = arith.muli %arg1, %c1_i32 : i32
    %4 = arith.addi %3, %arg2 : i32
    %c8_i32 = arith.constant 8 : i32
    %5 = arith.muli %arg0, %c8_i32 : i32
    %c384_i32 = arith.constant 384 : i32
    %6 = arith.muli %4, %c384_i32 : i32
    %7 = tpu.iota {dimensions = array<i32: 0>} : vector<8x384xi32>
    %8 = vector.broadcast %5 : i32 to vector<8x384xi32>
    %9 = arith.addi %8, %7 : vector<8x384xi32>
    %10 = tpu.iota {dimensions = array<i32: 1>} : vector<8x384xi32>
    %11 = vector.broadcast %6 : i32 to vector<8x384xi32>
    %12 = arith.addi %11, %10 : vector<8x384xi32>
    %c10_i32 = arith.constant 10 : i32
    %13 = vector.broadcast %c10_i32 : i32 to vector<8x384xi32>
    %14 = arith.cmpi slt, %9, %13 : vector<8x384xi32>
    %c300_i32 = arith.constant 300 : i32
    %15 = vector.broadcast %c300_i32 : i32 to vector<8x384xi32>
    %16 = arith.cmpi slt, %12, %15 : vector<8x384xi32>
    %17 = arith.andi %14, %16 : vector<8x384xi1>
    %18 = tpu.iota {dimensions = array<i32: 0>} : vector<8x8x384xi32>
    %19 = vector.broadcast %5 : i32 to vector<8x8x384xi32>
    %20 = arith.addi %19, %18 : vector<8x8x384xi32>
    %21 = tpu.iota {dimensions = array<i32: 2>} : vector<8x8x384xi32>
    %22 = vector.broadcast %6 : i32 to vector<8x8x384xi32>
    %23 = arith.addi %22, %21 : vector<8x8x384xi32>
    %c10_i32_1 = arith.constant 10 : i32
    %24 = vector.broadcast %c10_i32_1 : i32 to vector<8x8x384xi32>
    %25 = arith.cmpi slt, %20, %24 : vector<8x8x384xi32>
    %c300_i32_2 = arith.constant 300 : i32
    %26 = vector.broadcast %c300_i32_2 : i32 to vector<8x8x384xi32>
    %27 = arith.cmpi slt, %23, %26 : vector<8x8x384xi32>
    %28 = arith.andi %25, %27 : vector<8x8x384xi1>
    %c0 = arith.constant 0 : index
    %c0_3 = arith.constant 0 : index
    %29 = vector.load %arg4[%c0, %c0_3] : memref<8x384xbf16, #tpu.memory_space<vmem>>, vector<8x384xbf16>
    %30 = arith.extf %29 : vector<8x384xbf16> to vector<8x384xf32>
    %cst = arith.constant 0.000000e+00 : f32
    %31 = vector.broadcast %cst : f32 to vector<8x384xf32>
    %32 = arith.select %17, %30, %31 : vector<8x384xi1>, vector<8x384xf32>
    %c0_4 = arith.constant 0 : index
    %c0_5 = arith.constant 0 : index
    %c0_6 = arith.constant 0 : index
    %33 = vector.load %arg5[%c0_4, %c0_5, %c0_6] : memref<8x8x384xbf16, #tpu.memory_space<vmem>>, vector<8x8x384xbf16>
    %34 = arith.extf %33 : vector<8x8x384xbf16> to vector<8x8x384xf32>
    %cst_7 = arith.constant 0.000000e+00 : f32
    %35 = vector.broadcast %cst_7 : f32 to vector<8x8x384xf32>
    %36 = arith.select %28, %34, %35 : vector<8x8x384xi1>, vector<8x8x384xf32>
    %c0_8 = arith.constant 0 : index
    %c0_9 = arith.constant 0 : index
    %c0_10 = arith.constant 0 : index
    %37 = vector.load %arg6[%c0_8, %c0_9, %c0_10] : memref<8x8x384xi8, #tpu.memory_space<vmem>>, vector<8x8x384xi8>
    %38 = arith.sitofp %37 : vector<8x8x384xi8> to vector<8x8x384xf32>
    %cst_11 = arith.constant dense<0.000000e+00> : vector<8x384xf32>
    %39 = vector.multi_reduction <add>, %38, %cst_11 [1] : vector<8x8x384xf32> to vector<8x384xf32>
    %cst_12 = arith.constant 0.000000e+00 : f32
    %40 = vector.broadcast %cst_12 : f32 to vector<8x384xf32>
    %41 = arith.cmpf ogt, %39, %40 : vector<8x384xf32>
    %cst_13 = arith.constant 0.000000e+00 : f32
    %42 = vector.broadcast %cst_13 : f32 to vector<8x384xf32>
    %43 = arith.subf %42, %32 : vector<8x384xf32>
    %cst_14 = arith.constant 0.000000e+00 : f32
    %44 = vector.broadcast %cst_14 : f32 to vector<8x384xf32>
    %45 = arith.maximumf %43, %44 : vector<8x384xf32>
    %46 = vector.broadcast %cst_14 : f32 to vector<8x384xf32>
    %47 = arith.subf %43, %46 : vector<8x384xf32>
    %48 = arith.cmpf one, %47, %47 : vector<8x384xf32>
    %49 = vector.broadcast %cst_14 : f32 to vector<8x384xf32>
    %50 = arith.addf %43, %49 : vector<8x384xf32>
    %51 = math.absf %47 : vector<8x384xf32>
    %cst_15 = arith.constant 0.000000e+00 : f32
    %52 = vector.broadcast %cst_15 : f32 to vector<8x384xf32>
    %53 = arith.subf %52, %51 : vector<8x384xf32>
    %54 = math.exp %53 : vector<8x384xf32>
    %55 = math.log1p %54 : vector<8x384xf32>
    %56 = arith.addf %45, %55 : vector<8x384xf32>
    %57 = arith.select %48, %50, %56 : vector<8x384xi1>, vector<8x384xf32>
    %c0_16 = arith.constant 0 : index
    %c0_17 = arith.constant 0 : index
    %58 = vector.load %arg3[%c0_16, %c0_17] : memref<1x384xf32, #tpu.memory_space<vmem>>, vector<1x384xf32>
    %59 = vector.broadcast %58 : vector<1x384xf32> to vector<8x384xf32>
    %60 = arith.mulf %59, %57 : vector<8x384xf32>
    %61 = arith.addf %32, %57 : vector<8x384xf32>
    %62 = arith.select %41, %60, %61 : vector<8x384xi1>, vector<8x384xf32>
    %c0_18 = arith.constant 0 : index
    %c0_19 = arith.constant 0 : index
    %63 = vector.load %arg7[%c0_18, %c0_19] : memref<8x384xf32, #tpu.memory_space<vmem>>, vector<8x384xf32>
    %cst_20 = arith.constant 0.000000e+00 : f32
    %64 = vector.broadcast %cst_20 : f32 to vector<8x384xf32>
    %65 = arith.select %17, %62, %64 : vector<8x384xi1>, vector<8x384xf32>
    %66 = arith.addf %63, %65 : vector<8x384xf32>
    %c0_21 = arith.constant 0 : index
    %c0_22 = arith.constant 0 : index
    %67 = vector.load %arg7[%c0_21, %c0_22] : memref<8x384xf32, #tpu.memory_space<vmem>>, vector<8x384xf32>
    tpu.vector_store %arg7[%c0_21, %c0_22], %66 {strides = array<i32>} : memref<8x384xf32, #tpu.memory_space<vmem>>, vector<8x384xf32>,
    %cst_23 = arith.constant dense<0xFF800000> : vector<8x384xf32>
    %68 = vector.multi_reduction <maximumf>, %36, %cst_23 [1] : vector<8x8x384xf32> to vector<8x384xf32>
    %69 = vector.shape_cast %68 : vector<8x384xf32> to vector<8x1x384xf32>
    %70 = vector.shape_cast %69 : vector<8x1x384xf32> to vector<8x384xf32>
    %71 = vector.broadcast %69 : vector<8x1x384xf32> to vector<8x8x384xf32>
    %72 = arith.subf %36, %71 : vector<8x8x384xf32>
    %73 = math.exp %72 : vector<8x8x384xf32>
    %cst_24 = arith.constant dense<0.000000e+00> : vector<8x384xf32>
    %74 = vector.multi_reduction <add>, %73, %cst_24 [1] : vector<8x8x384xf32> to vector<8x384xf32>
    %75 = math.log %74 : vector<8x384xf32>
    %76 = arith.addf %70, %75 : vector<8x384xf32>
    %77 = arith.mulf %38, %36 : vector<8x8x384xf32>
    %cst_25 = arith.constant dense<0.000000e+00> : vector<8x384xf32>
    %78 = vector.multi_reduction <add>, %77, %cst_25 [1] : vector<8x8x384xf32> to vector<8x384xf32>
    %c0_26 = arith.constant 0 : index
    %c0_27 = arith.constant 0 : index
    %79 = vector.load %arg8[%c0_26, %c0_27] : memref<8x384xf32, #tpu.memory_space<vmem>>, vector<8x384xf32>
    %80 = arith.mulf %39, %76 : vector<8x384xf32>
    %81 = arith.subf %80, %78 : vector<8x384xf32>
    %cst_28 = arith.constant 0.000000e+00 : f32
    %82 = vector.broadcast %cst_28 : f32 to vector<8x384xf32>
    %83 = arith.select %17, %81, %82 : vector<8x384xi1>, vector<8x384xf32>
    %84 = arith.addf %79, %83 : vector<8x384xf32>
    %c0_29 = arith.constant 0 : index
    %c0_30 = arith.constant 0 : index
    %85 = vector.load %arg8[%c0_29, %c0_30] : memref<8x384xf32, #tpu.memory_space<vmem>>, vector<8x384xf32>
    tpu.vector_store %arg8[%c0_29, %c0_30], %84 {strides = array<i32>} : memref<8x384xf32, #tpu.memory_space<vmem>>, vector<8x384xf32>,
    %c0_31 = arith.constant 0 : index
    %c0_32 = arith.constant 0 : index
    %86 = vector.load %arg9[%c0_31, %c0_32] : memref<8x384xf32, #tpu.memory_space<vmem>>, vector<8x384xf32>
    %87 = arith.andi %17, %41 : vector<8x384xi1>
    %cst_33 = arith.constant 1.000000e+00 : f32
    %cst_34 = arith.constant 0.000000e+00 : f32
    %88 = vector.broadcast %cst_33 : f32 to vector<8x384xf32>
    %89 = vector.broadcast %cst_34 : f32 to vector<8x384xf32>
    %90 = arith.select %87, %88, %89 : vector<8x384xi1>, vector<8x384xf32>
    %91 = arith.addf %86, %90 : vector<8x384xf32>
    %c0_35 = arith.constant 0 : index
    %c0_36 = arith.constant 0 : index
    %92 = vector.load %arg9[%c0_35, %c0_36] : memref<8x384xf32, #tpu.memory_space<vmem>>, vector<8x384xf32>
    tpu.vector_store %arg9[%c0_35, %c0_36], %91 {strides = array<i32>} : memref<8x384xf32, #tpu.memory_space<vmem>>, vector<8x384xf32>,
    return
  }
  func.func @transform_0(%arg0: i32, %arg1: i32, %arg2: i32) -> (i32, i32) {
    %c1_i32 = arith.constant 1 : i32
    %0 = arith.muli %arg1, %c1_i32 : i32
    %1 = arith.addi %0, %arg2 : i32
    %c0_i32 = arith.constant 0 : i32
    %2 = arith.minsi %1, %c0_i32 : i32
    %c0_i32_0 = arith.constant 0 : i32
    %c0_i32_1 = arith.constant 0 : i32
    return %c0_i32_0, %2 : i32, i32
  }
  func.func @transform_1(%arg0: i32, %arg1: i32, %arg2: i32) -> (i32, i32) {
    %c1_i32 = arith.constant 1 : i32
    %0 = arith.muli %arg1, %c1_i32 : i32
    %1 = arith.addi %0, %arg2 : i32
    %c0_i32 = arith.constant 0 : i32
    %2 = arith.minsi %1, %c0_i32 : i32
    %c0_i32_0 = arith.constant 0 : i32
    return %arg0, %2 : i32, i32
  }
  func.func @transform_2(%arg0: i32, %arg1: i32, %arg2: i32) -> (i32, i32, i32) {
    %c1_i32 = arith.constant 1 : i32
    %0 = arith.muli %arg1, %c1_i32 : i32
    %1 = arith.addi %0, %arg2 : i32
    %c0_i32 = arith.constant 0 : i32
    %2 = arith.minsi %1, %c0_i32 : i32
    %c0_i32_0 = arith.constant 0 : i32
    %c0_i32_1 = arith.constant 0 : i32
    return %arg0, %c0_i32_0, %2 : i32, i32, i32
  }
  func.func @transform_3(%arg0: i32, %arg1: i32, %arg2: i32) -> (i32, i32, i32) {
    %c1_i32 = arith.constant 1 : i32
    %0 = arith.muli %arg1, %c1_i32 : i32
    %1 = arith.addi %0, %arg2 : i32
    %c0_i32 = arith.constant 0 : i32
    %2 = arith.minsi %1, %c0_i32 : i32
    %c0_i32_0 = arith.constant 0 : i32
    %c0_i32_1 = arith.constant 0 : i32
    return %arg0, %c0_i32_0, %2 : i32, i32, i32
  }
  func.func @transform_4(%arg0: i32, %arg1: i32, %arg2: i32) -> (i32, i32) {
    %c0_i32 = arith.constant 0 : i32
    return %arg0, %arg1 : i32, i32
  }
  func.func @transform_5(%arg0: i32, %arg1: i32, %arg2: i32) -> (i32, i32) {
    %c0_i32 = arith.constant 0 : i32
    return %arg0, %arg1 : i32, i32
  }
  func.func @transform_6(%arg0: i32, %arg1: i32, %arg2: i32) -> (i32, i32) {
    %c0_i32 = arith.constant 0 : i32
    return %arg0, %arg1 : i32, i32
  }
}

</mosaic_0001>

<bundles_post_ra>
// kernel: tpu_custom_call.1
= control target key start
LH: loop header
LB: loop body
LE: loop exit
PB: predicated region body
PF: predicated region fallthrough
CT: control target
= control target key end

     0   :  { %s4395_s0 = inlined_call_operand.hbm [shape: f32[1,300], index: 0, kind: input, shape index: {}]   ;;  %s4396_s1 = inlined_call_operand.hbm [shape: bf16[10,300], index: 1, kind: input, shape index: {}]   ;;  %s4397_s2 = inlined_call_operand.hbm [shape: bf16[10,8,300], index: 2, kind: input, shape index: {}]   ;;  %s4398_s3 = inlined_call_operand.hbm [shape: s8[10,8,300], index: 3, kind: input, shape index: {}]   ;;  %s4399_s4 = inlined_call_operand.hbm [shape: f32[16,384], index: 4, kind: output, shape index: {0}]   ;;  %s4400_s5 = inlined_call_operand.hbm [shape: f32[16,384], index: 5, kind: output, shape index: {1}]   ;;  %s4401_s6 = inlined_call_operand.hbm [shape: f32[16,384], index: 6, kind: output, shape index: {2}]  }
   0x1   :  { %4493 = sst [smem:[#allocation48_spill]] %s4395_s0 }
   0x2   :  { %12 = vsyncpa [#allocation3], 0 }
   0x3   :  { %13 = vsyncpa [#allocation6], 0 }
   0x4   :  { %15 = vsyncpa [#allocation6 + $0x1], 0 }
   0x5   :  { %16 = vsyncpa [#allocation9], 0 }
   0x6   :  { %18 = vsyncpa [#allocation9 + $0x1], 0 }
   0x7   :  { %19 = vsyncpa [#allocation4], 0 }
   0x8   :  { %21 = vsyncpa [#allocation4 + $0x1], 0 }
   0x9   :  { %22 = vsyncpa [#allocation12], 0 }
   0xa   :  { %24 = vsyncpa [#allocation12 + $0x1], 0  ;;  %s2750_s21 = smov 0   ;;  %s2752_s22 = smov 0  }
   0xb   :  { %s2754_s23 = smov 0   ;;  %s2756_s24 = smov 0  }
   0xc   :  { %s2758_s25 = smov 0   ;;  %s2760_s26 = smov 0  }
   0xd LB: > { %4494 = sst [smem:[#allocation19_spill]] %s2688_s23  ;;  %s2781_s27 = sadd.s32 4294967295, %s2700_s26   ;;  %s2700_s26 = sphi %s2760_s26, %s30_s26   ;;  %s2696_s25 = sphi %s2758_s25, %s4690_s25   ;;  %s2692_s24 = sphi %s2756_s24, %s4689_s24   ;;  %s2688_s23 = sphi %s2754_s23, %s4685_s23   ;;  %s2684_s22 = sphi %s2752_s22, %s4688_s22   ;;  %s2680_s21 = sphi %s2750_s21, %s4687_s21  }
   0xe   : > { %s4404_s28 = sadd.s32 4294967294, %s2700_s26   ;;  %s49_s29 = sadd.s32 1, %s2696_s25 }
   0xf   : > { %s96_s30 = sadd.s32 1, %s2688_s23  ;;  %p51_p0 = scmp.ge.s32.totalorder %s49_s29, 2 }
  0x10   : > { %p103_p1 = scmp.ne.s32.totalorder %s2688_s23, %s2684_s22  ;;  %p104_p2 = scmp.eq.s32.totalorder %s2700_s26, 0 }
  0x11   : > { %p109_p3 = scmp.ne.s32.totalorder %s2684_s22, %s2680_s21  ;;  %s4692_s29 = smov (%p51_p0, %s49_s29), 0 }
  0x12   : > { %4495 = sst [smem:[#allocation20_spill]] %s4692_s29  ;;  %p2793_p4 = por %p104_p2, %p103_p1 }
  0x13   : > { %p110_p5 = scmp.eq.s32.totalorder %s2781_s27, 0  ;;  %s91_s8 = ssub.s32 %s2696_s25, %s4692_s29 }
  0x14   : > { %p203_p6 = scmp.eq.s32.totalorder %s2781_s27, 1  ;;  %p94_p7 = scmp.eq.s32.totalorder %s91_s8, 0 }
  0x15   : > { %p2803_p8 = por %p110_p5, %p109_p3  ;;  %p209_p10 = scmp.eq.s32.totalorder %s4404_s28, 1 }
  0x16   : > { %p2807_p9 = por %p203_p6, %p103_p1  ;;  %p2211_p12 = scmp.ge.s32.totalorder %s2700_s26, 1 }
  0x17   : > { %s4497_s9 = scalar_select %p2803_p8, 1, 0 }
  0x18   : > { %s4498_s10 = scalar_select %p2807_p9, 1, 0 }
  0x19   : > { %s2814_s11 = scalar_select %p94_p7, %s2688_s23, %s96_s30  }
  0x1a   : > { %p2816_p11 = por %p209_p10, %p109_p3  ;;  %p272_p13 = scmp.lt.s32.totalorder %s2700_s26, 3 }
  0x1b   : > { %4499 = sst [smem:[#allocation21_spill]] %s2814_s11  ;;  %s2702_s14 = smov [#allocation2]  }
  0x1c   : > { %s4500_s12 = scalar_select %p2816_p11, 1, 0 }
  0x1d   : > { %p2822_p0 = pnand %p2211_p12, %p272_p13  ;;  %s291_s15 = sshll.u32 %s2702_s14, 4  ;;  %s292_s15 = int_to_ptr.vmem [resolvable:$true] %s291_s15 }
  0x1e   : > { %s2463_s16 = scalar_lea.vmem %s292_s15, 48  ;;  %s2470_s17 = scalar_lea.vmem %s292_s15, 64 }
  0x1f   : > { %p2264_p1 = pneg %p2822_p0  ;;  %p2464_p3 = scmp.ne.s32.totalorder %s292_s15, %s2463_s16 }
  0x20   : > { %p2471_p11 = scmp.lt.s32.totalorder %s292_s15, %s292_s15  ;;  %p2472_p9 = scmp.lt.s32.totalorder %s2470_s17, %s2463_s16 }
  0x21   : > { %p2265_p2 = pnand %p2264_p1, %p110_p5 }
  0x22   : > { %p2473_p12 = por %p2472_p9, %p2471_p11 }
  0x23   : > { %p2454_p6 = pneg %p2265_p2 }
  0x25   : > { %p2466_p7 = pnand %p2464_p3, %p2454_p6 }
  0x27   : > { %p2467_p10 = pneg %p2466_p7 }
  0x29   : > { %p2474_p13 = pnand %p2473_p12, %p2467_p10 }
  0x2b   : > { %2477 = shalt.err (!%p2474_p13)
}
  0x2c   : > { %s4502_s0 = sld [smem:[#allocation48_spill]]  ;;  %p4407_p8 = scmp.ge.s32.totalorder %s2700_s26, 2 }
  0x2d   : > { %s302_s20 = sand.u32 (!%p4407_p8), 1, %s2700_s26   ;;  %s2838_s30 = sand.u32 (!%p4407_p8), 1, %s2688_s23  }
  0x2e   : > { %298 = sbr.rel (%p4407_p8) target bundleno = 132 (0x84), region = 20  ;;  %s2845_s28 = scalar_lea.sflag (!%p4407_p8), [#allocation6], %s302_s20 }
  0x2f   : > { %s2237_s8 = smul.u32 (!%p4407_p8), 12, %s2838_s30  ;;  %s2703_s29 = smov (!%p4407_p8), [#allocation5]  }
  0x30   : > { %s2238_s14 = smul.u32 (!%p4407_p8), 192, %s2696_s25  ;;  %s2494_s11 = sshll.u32 (!%p4407_p8), %s2703_s29, 4  ;;  %s2495_s11 = int_to_ptr.vmem [resolvable:$false] %s2494_s11 }
  0x31   : > { %s2496_s23 = scalar_lea.vmem (!%p4407_p8), %s2495_s11, 384 }
  0x32   : > { %2267 = dma.hbm_to_vmem [thread:$0]  (!%p2265_p2), %s4502_s0, 48, %s292_s15, [#allocation3]  }
  0x33   : > { %s317_s18 = scalar_lea.hbm %s4396_s1, %s2238_s14  ;;  %s306_s15 = scalar_lea.vmem [#allocation5], %s2237_s8 }
  0x34   : > { %s319_s19 = sshll.u32 %s306_s15, 4  ;;  %s320_s19 = int_to_ptr.vmem [resolvable:$true] %s319_s19 }
  0x35   : > { %s2490_s0 = scalar_lea.vmem %s320_s19, 192  ;;  %p2497_p2 = scmp.lt.s32.totalorder %s320_s19, %s2495_s11 }
  0x36   : > { %p2491_p9 = scmp.ne.s32.totalorder %s320_s19, %s2490_s0  ;;  %p2498_p6 = scmp.lt.s32.totalorder %s2496_s23, %s2490_s0 }
  0x38   : > { %p2492_p11 = pnand %p2491_p9, %p2793_p4  ;;  %p2499_p3 = por %p2498_p6, %p2497_p2 }
  0x3a   : > { %p2493_p1 = pneg %p2492_p11 }
  0x3c   : > { %p2500_p7 = pnand %p2499_p3, %p2493_p1 }
  0x3e   : > { %2503 = shalt.err (!%p2500_p7)
}
  0x3f   : > { %2252 = dma.hbm_to_vmem [thread:$0]  (%p2793_p4), %s317_s18, 192, %s320_s19, %s2845_s28  }
  0x40   : > { %325 = sbr.rel (!%p2793_p4) target bundleno = 98 (0x62), region = 28  ;;  %s2215_s8 = sshll.u32 (%p2793_p4), %s2696_s25, 3 }
  0x41   : > { %s2239_s20 = smul.u32 (%p2793_p4), 96, %s2838_s30  ;;  %s336_s29 = ssub.s32 (%p2793_p4), 10, %s2215_s8 }
  0x42   : > { %p337_p10 = scmp.lt.s32.totalorder (%p2793_p4), %s336_s29, 8 }
  0x43   : > { %s330_s23 = scalar_lea.vmem (%p2793_p4), [#allocation7], %s2239_s20 }
  0x45   : > { %s4694_s29 = smov (!%p337_p10, %s336_s29), 8 }
  0x46   : > { %s2856_s11 = smul.u32 192, %s4694_s29 }
  0x48   : > { %s342_s0 = ssub.s32 1536, %s2856_s11 }
  0x49   : > { %343 = vsyncadd %s2845_s28, %s342_s0  ;;  %p2218_p12 = scmp.ne.s32.totalorder %s2856_s11, 0  ;;  %s2240_s14 = smul.u32 1536, %s2696_s25 }
  0x4a   : > { %s350_s16 = sshll.u32 %s330_s23, 4  ;;  %s2508_s29 = scalar_lea.hbm %s4397_s2, 1920  ;;  %s2867_s16 = int_to_ptr.vmem [resolvable:$true] %s350_s16 }
  0x4b   : > { %s2865_s15 = scalar_lea.hbm %s4397_s2, %s2240_s14 }
  0x4c   : > { %s2504_s19 = scalar_lea.hbm %s2865_s15, %s2856_s11 }
  0x4d   : > { %p2505_p13 = scmp.ne.s32.totalorder %s2865_s15, %s2504_s19  ;;  %p2510_p1 = scmp.lt.s32.totalorder %s2508_s29, %s2504_s19 }
  0x4f   : > { %p2506_p9 = pnand %p2505_p13, %p2218_p12 }
  0x51   : > { %p2507_p11 = pneg %p2506_p9 }
  0x53   : > { %p2512_p2 = pnand %p2510_p1, %p2507_p11 }
  0x55   : > { %2515 = shalt.err (!%p2512_p2)
}
  0x56   : > { %s2516_s0 = scalar_lea.vmem %s2867_s16, %s2856_s11  ;;  %s2704_s23 = smov [#allocation7]  }
  0x57   : > { %p2517_p6 = scmp.ne.s32.totalorder %s2867_s16, %s2516_s0  ;;  %s2520_s14 = sshll.u32 %s2704_s23, 4  ;;  %s2521_s14 = int_to_ptr.vmem [resolvable:$false] %s2520_s14 }
  0x58   : > { %s2522_s17 = scalar_lea.vmem %s2521_s14, 3072  ;;  %p2523_p10 = scmp.lt.s32.totalorder %s2867_s16, %s2521_s14 }
  0x59   : > { %p2518_p3 = pnand %p2517_p6, %p2218_p12  ;;  %p2524_p13 = scmp.lt.s32.totalorder %s2522_s17, %s2516_s0 }
  0x5b   : > { %p2519_p7 = pneg %p2518_p3  ;;  %p2525_p9 = por %p2524_p13, %p2523_p10 }
  0x5d   : > { %p2526_p8 = pnand %p2525_p9, %p2519_p7 }
  0x5f   : > { %2529 = shalt.err (!%p2526_p8)
}
  0x60   : > { %s2705_s18 = smov 192   ;;  %s2706_s19 = smov 12  }
  0x61   : > { %356 = dma.hbm_to_vmem [thread:$0]  (%p2218_p12), %s2865_s15, %s2856_s11, %s2867_s16, %s2845_s28, %s2705_s18, %s2705_s18, %s2706_s19  }
  0x62 PF: > { %359 = sbr.rel (!%p2793_p4) target bundleno = 132 (0x84), region = 32  ;;  %s2222_s8 = sshll.u32 (%p2793_p4), %s2696_s25, 3 }
  0x63   : > { %s2241_s20 = smul.u32 (%p2793_p4), 48, %s2838_s30  ;;  %s370_s29 = ssub.s32 (%p2793_p4), 10, %s2222_s8 }
  0x64   : > { %p371_p8 = scmp.lt.s32.totalorder (%p2793_p4), %s370_s29, 8  ;;  %s361_s14 = scalar_lea.sflag (%p2793_p4), [#allocation9], %s2838_s30 }
  0x65   : > { %s364_s17 = scalar_lea.vmem (%p2793_p4), [#allocation8], %s2241_s20 }
  0x67   : > { %s4696_s29 = smov (!%p371_p8, %s370_s29), 8 }
  0x68   : > { %s2893_s0 = smul.u32 96, %s4696_s29 }
  0x6a   : > { %s376_s23 = ssub.s32 768, %s2893_s0 }
  0x6b   : > { %377 = vsyncadd %s361_s14, %s376_s23  ;;  %p2225_p4 = scmp.ne.s32.totalorder %s2893_s0, 0  ;;  %s2242_s28 = smul.u32 768, %s2696_s25 }
  0x6c   : > { %s384_s7 = sshll.u32 %s364_s17, 4  ;;  %s2534_s8 = scalar_lea.hbm %s4398_s3, 960  ;;  %s2906_s7 = int_to_ptr.vmem [resolvable:$true] %s384_s7 }
  0x6d   : > { %s2904_s15 = scalar_lea.hbm %s4398_s3, %s2242_s28 }
  0x6e   : > { %s2530_s18 = scalar_lea.hbm %s2904_s15, %s2893_s0 }
  0x6f   : > { %p2531_p12 = scmp.ne.s32.totalorder %s2904_s15, %s2530_s18  ;;  %p2536_p2 = scmp.lt.s32.totalorder %s2534_s8, %s2530_s18 }
  0x71   : > { %p2532_p11 = pnand %p2531_p12, %p2225_p4 }
  0x73   : > { %p2533_p1 = pneg %p2532_p11 }
  0x75   : > { %p2538_p6 = pnand %p2536_p2, %p2533_p1 }
  0x77   : > { %2541 = shalt.err (!%p2538_p6)
}
  0x78   : > { %s2542_s29 = scalar_lea.vmem %s2906_s7, %s2893_s0  ;;  %s2707_s23 = smov [#allocation8]  }
  0x79   : > { %p2543_p3 = scmp.ne.s32.totalorder %s2906_s7, %s2542_s29  ;;  %s2546_s17 = sshll.u32 %s2707_s23, 4  ;;  %s2547_s17 = int_to_ptr.vmem [resolvable:$false] %s2546_s17 }
  0x7a   : > { %s2548_s28 = scalar_lea.vmem %s2547_s17, 1536  ;;  %p2549_p13 = scmp.lt.s32.totalorder %s2906_s7, %s2547_s17 }
  0x7b   : > { %p2544_p7 = pnand %p2543_p3, %p2225_p4  ;;  %p2550_p9 = scmp.lt.s32.totalorder %s2548_s28, %s2542_s29 }
  0x7d   : > { %p2545_p10 = pneg %p2544_p7  ;;  %p2551_p8 = por %p2550_p9, %p2549_p13 }
  0x7f   : > { %p2552_p12 = pnand %p2551_p8, %p2545_p10 }
  0x81   : > { %2555 = shalt.err (!%p2552_p12)
}
  0x82   : > { %s2708_s11 = smov 96   ;;  %s2709_s16 = smov 6  }
  0x83   : > { %390 = dma.hbm_to_vmem [thread:$0]  (%p2225_p4), %s2904_s15, %s2893_s0, %s2906_s7, %s361_s14, %s2708_s11, %s2708_s11, %s2709_s16  }
  0x84 PF: > { %396 = sbr.rel (%p2822_p0) target bundleno = 500 (0x1f4), region = 36 }
  0x89   : > { %2659 = dma.done.wait (%p110_p5), [#allocation3], 48  }
  0x8a   : > { %2661 = vsyncadd (%p110_p5), [#allocation3], 4294967248  ;;  %s402_s18 = sand.u32 1, %s2781_s27   ;;  %s2937_s19 = sand.u32 1, %s2684_s22  }
  0x8b   : > { %s2243_s30 = smul.u32 12, %s2937_s19  ;;  %s403_s0 = scalar_lea.sflag [#allocation6], %s402_s18 }
  0x8c   : > { %p4503_p0 = scmp.ne.s32.totalorder %s4497_s9, 0 }
  0x8d   : > { %s2942_s14 = scalar_lea.vmem [#allocation5], %s2243_s30 }
  0x8e   : > { %2663 = dma.done.wait (%p4503_p0), %s403_s0, 1728  }
  0x8f   : > { %2665 = vsyncadd (%p4503_p0), %s403_s0, 4294965568  ;;  %s2244_s13 = smul.u32 96, %s2937_s19  ;;  %s421_s20 = scalar_lea.sflag [#allocation9], %s2937_s19 }
  0x90   : > { %s2245_s7 = smul.u32 48, %s2937_s19 }
  0x91   : > { %s2950_s15 = scalar_lea.vmem [#allocation7], %s2244_s13 }
  0x92   : > { %s2953_s8 = scalar_lea.vmem [#allocation8], %s2245_s7 }
  0x93   : > { %2667 = dma.done.wait (%p4503_p0), %s421_s20, 768  }
  0x94   : > { %2669 = vsyncadd (%p4503_p0), %s421_s20, 4294966528  ;;  %s2231_s29 = sshll.u32 %s2692_s24, 3  ;;  %v520_v0 = vlaneseq  ;;  %v2977_v7 = vld [vmem:[%s2950_s15] sm:$0xff]  ;;  %v2980_v8 = vld [vmem:[%s2950_s15 + $0xc] sm:$0xff]  ;;  %vm1102_vm8 = vcmask 1041409   ;;  %vm1105_vm9 = vcmask 1042434  }
  0x95   : > { %v2960_v1 = vstv %s2231_s29  ;;  %4509 = vst [vmem:[#allocation27_spill] sm:$0xff] %v2980_v8  ;;  %v2983_v9 = vld [vmem:[%s2950_s15 + $0x18] sm:$0xff]  ;;  %v2995_v13 = vld [vmem:[%s2950_s15 + $0x24] sm:$0xff]  ;;  %v2998_v14 = vld [vmem:[%s2950_s15 + $0x30] sm:$0xff]  ;;  %v602_v16 = vunpack.c.l.bf16 %v2977_v7  ;;  %v605_v22 = vunpack.c.l.bf16 %v2980_v8  ;;  %vm1108_vm10 = vcmask 1043459   ;;  %s3382_s9 = smul.u32 24, %s2937_s19 }
  0x96   : > { %v2962_v2 = vshrl.u32 %v520_v0, 7  ;;  %v2965_v3 = vadd.s32 1, %v2960_v1  ;;  %v2968_v4 = vadd.s32 2, %v2960_v1  ;;  %v2971_v5 = vadd.s32 3, %v2960_v1  ;;  %v3001_v15 = vld [vmem:[%s2950_s15 + $0x3c] sm:$0xff]  ;;  %v3010_v18 = vld [vmem:[%s2950_s15 + $0x48] sm:$0xff] }
  0x97   : > { %v2974_v6 = vadd.s32 4, %v2960_v1  ;;  %v2986_v10 = vadd.s32 5, %v2960_v1  ;;  %v2989_v11 = vadd.s32 6, %v2960_v1  ;;  %v2992_v12 = vadd.s32 7, %v2960_v1  ;;  %v3013_v19 = vld [vmem:[%s2950_s15 + $0x54] sm:$0xff]  ;;  %s3434_s23 = scalar_lea.vmem [#allocation11], %s3382_s9 }
  0x98   : > { %4504 = vst [vmem:[#allocation22_spill] sm:$0xff] %v2962_v2  ;;  %4505 = vst [vmem:[#allocation23_spill] sm:$0xff] %v2965_v3  ;;  %v3006_v17 = vadd.s32 %v2960_v1, %v2962_v2  ;;  %vm546_vm0 = vcmp.lt.s32.totalorder %v2960_v1, 10  ;;  %v3016_v20 = vld [vmem:[%s2953_s8] sm:$0x3f]  ;;  %v3018_v21 = vand.u32 127, %v520_v0  ;;  %v608_v23 = vunpack.c.l.bf16 %v2983_v9 }
  0x99   : > { %4506 = vst [vmem:[#allocation24_spill] sm:$0xff] %v2968_v4  ;;  %4507 = vst [vmem:[#allocation25_spill] sm:$0xff] %v2971_v5  ;;  %v611_v24 = vunpack.c.l.bf16 %v2995_v13  ;;  %v3024_v25 = vld [vmem:[%s2953_s8 + $0x6] sm:$0x3f]  ;;  %v3027_v26 = vld [vmem:[%s2953_s8 + $0xc] sm:$0x3f]  ;;  %v658_v37 = vunpack.c.0.s8 %v3016_v20 }
  0x9a   : > { %4508 = vst [vmem:[#allocation26_spill] sm:$0xff] %v2974_v6  ;;  %4510 = vst [vmem:[#allocation28_spill] sm:$0xff] %v2986_v10  ;;  %v3034_v31 = vld [vmem:[%s2953_s8 + $0x12] sm:$0x3f]  ;;  %v3040_v34 = vsel %vm546_vm0, %v602_v16, 0.0  ;;  %v661_v38 = vunpack.c.0.s8 %v3024_v25  ;;  %vm547_vm1 = vcmp.lt.s32.totalorder %v2965_v3, 10  ;;  %v664_v41 = vunpack.c.0.s8 %v3027_v26 }
  0x9b   : > { %4511 = vst [vmem:[#allocation29_spill] sm:$0xff] %v2989_v11  ;;  %4512 = vst [vmem:[#allocation30_spill] sm:$0xff] %v2992_v12  ;;  %v3043_v35 = vld [vmem:[%s2953_s8 + $0x18] sm:$0x3f]  ;;  %v3046_v36 = vld [vmem:[%s2953_s8 + $0x1e] sm:$0x3f]  ;;  %v667_v42 = vunpack.c.0.s8 %v3034_v31  ;;  %v3067_v47 = vcvt.s32.f32 %v658_v37 }
  0x9c   : > { %4513 = vst [vmem:[#allocation31_spill] sm:$0xff] %v3006_v17  ;;  %4514 = vst [vmem:[#allocation32_spill] sm:$0xff] %v3018_v21  ;;  %v3052_v39 = vld [vmem:[%s2953_s8 + $0x24] sm:$0x3f]  ;;  %v3055_v40 = vld [vmem:[%s2953_s8 + $0x2a] sm:$0x3f]  ;;  %v670_v43 = vunpack.c.0.s8 %v3043_v35  ;;  %v673_v44 = vunpack.c.0.s8 %v3046_v36  ;;  %v3069_v48 = vcvt.s32.f32 %v661_v38  ;;  %v3073_v49 = vcvt.s32.f32 %v664_v41 }
  0x9d   : > { %4515 = vst [vmem:[#allocation33_spill] sm:$0xff] %v3027_v26  ;;  %4516 = vst [vmem:[#allocation34_spill] sm:$0xff] %v3034_v31  ;;  %vm548_vm2 = vcmp.lt.s32.totalorder %v2968_v4, 10  ;;  %vm549_vm3 = vcmp.lt.s32.totalorder %v2971_v5, 10  ;;  %vm550_vm4 = vcmp.lt.s32.totalorder %v2974_v6, 10  ;;  %vm4446_vm5 = vcmp.lt.s32.totalorder %v2986_v10, 10 }
  0x9e   : > { %4517 = vst [vmem:[#allocation35_spill] sm:$0xff] %v3043_v35  ;;  %4518 = vst [vmem:[#allocation36_spill] sm:$0xff] %v3046_v36  ;;  %v676_v45 = vunpack.c.0.s8 %v3052_v39  ;;  %v679_v46 = vunpack.c.0.s8 %v3055_v40  ;;  %vm4445_vm6 = vcmp.lt.s32.totalorder %v2989_v11, 10  ;;  %vm4444_vm7 = vcmp.lt.s32.totalorder %v2992_v12, 10  ;;  %s4069_s17 = smul.u32 384, %s2692_s24  ;;  %s1976_s28 = sshll.u32 %s3434_s23, 4  ;;  %s4094_s28 = int_to_ptr.vmem [resolvable:$true] %s1976_s28 }
  0x9f   : > { %4519 = vst [vmem:[#allocation37_spill] sm:$0xff] %v3052_v39  ;;  %4520 = vst [vmem:[#allocation38_spill] sm:$0xff] %v3055_v40  ;;  %v3075_v50 = vcvt.s32.f32 %v667_v42  ;;  %v3077_v51 = vcvt.s32.f32 %v670_v43  ;;  %v3079_v52 = vcvt.s32.f32 %v673_v44  ;;  %v706_v55 = vrot.slane %v3067_v47, 4  ;;  %s4102_s30 = scalar_lea.vmem [#allocation10], %s3382_s9  ;;  %s4115_s0 = scalar_lea.sflag [#allocation12], %s402_s18 }
  0xa0   : > { %v3081_v53 = vcvt.s32.f32 %v676_v45  ;;  %v3083_v54 = vcvt.s32.f32 %v679_v46  ;;  %v724_v56 = vrot.slane %v3069_v48, 4  ;;  %v742_v57 = vrot.slane %v3073_v49, 4  ;;  %s4092_s16 = scalar_lea.hbm %s4400_s5, %s4069_s17  ;;  %p4644_p4 = scmp.ne.s32.totalorder %s4498_s10, 0 }
  0xa1   : > { %v760_v58 = vrot.slane %v3075_v50, 4  ;;  %v778_v59 = vrot.slane %v3077_v51, 4  ;;  %v796_v60 = vrot.slane %v3079_v52, 4  ;;  %v707_v61 = vadd.f32 %v706_v55, %v3067_v47  ;;  %s2710_s13 = smov [#allocation11]  }
  0xa2   : > { %v725_v62 = vadd.f32 %v724_v56, %v3069_v48  ;;  %v814_v63 = vrot.slane %v3081_v53, 4  ;;  %v832_v0 = vrot.slane %v3083_v54, 4  ;;  %v743_v16 = vadd.f32 %v742_v57, %v3073_v49  ;;  %s2560_s7 = sshll.u32 %s2710_s13, 4  ;;  %s2561_s7 = int_to_ptr.vmem [resolvable:$false] %s2560_s7 }
  0xa3   : > { %v761_v37 = vadd.f32 %v760_v58, %v3075_v50  ;;  %v779_v38 = vadd.f32 %v778_v59, %v3077_v51  ;;  %v797_v41 = vadd.f32 %v796_v60, %v3079_v52  ;;  %v708_v42 = vrot.slane %v707_v61, 2  ;;  %p2563_p2 = scmp.lt.s32.totalorder %s4094_s28, %s2561_s7 }
  0xa4   : > { %v726_v43 = vrot.slane %v725_v62, 2  ;;  %v815_v44 = vadd.f32 %v814_v63, %v3081_v53  ;;  %v833_v45 = vadd.f32 %v832_v0, %v3083_v54  ;;  %v744_v46 = vrot.slane %v743_v16, 2 }
  0xa5   : > { %v762_v55 = vrot.slane %v761_v37, 2  ;;  %v780_v56 = vrot.slane %v779_v38, 2  ;;  %v798_v32 = vrot.slane %v797_v41, 2  ;;  %v709_v27 = vadd.f32 %v708_v42, %v707_v61 }
  0xa6   : > { %v727_v33 = vadd.f32 %v726_v43, %v725_v62  ;;  %v816_v30 = vrot.slane %v815_v44, 2  ;;  %v834_v57 = vrot.slane %v833_v45, 2  ;;  %v3101_v29 = vadd.f32 %v744_v46, %v743_v16 }
  0xa7   : > { %v3103_v58 = vadd.f32 %v762_v55, %v761_v37  ;;  %v3105_v59 = vadd.f32 %v780_v56, %v779_v38  ;;  %v3107_v60 = vadd.f32 %v798_v32, %v797_v41  ;;  %v3113_v63 = vsel %vm547_vm1, %v605_v22, 0.0 }
  0xa8   : > { %v710_v0 = vrot.slane %v709_v27, 1  ;;  %v728_v28 = vrot.slane %v727_v33, 1  ;;  %v3115_v61 = vadd.f32 %v816_v30, %v815_v44  ;;  %v3121_v62 = vsel %vm548_vm2, %v608_v23, 0.0 }
  0xa9   : > { %v3127_v32 = vsel %vm549_vm3, %v611_v24, 0.0  ;;  %v4521_v16 = vunpack.c.l.bf16 %v2998_v14  ;;  %v4522_v30 = vunpack.c.l.bf16 %v3001_v15  ;;  %v4523_v23 = vunpack.c.l.bf16 %v3010_v18 }
  0xaa   : > { %v4524_v24 = vunpack.c.l.bf16 %v3013_v19  ;;  %v3154_v43 = vadd.f32 %v834_v57, %v833_v45  ;;  %v3156_v44 = vadd.f32 %v710_v0, %v709_v27  ;;  %v1198_v42 = vrot.slane %v3121_v62, 4 }
  0xab   : > { %v3133_v22 = vsel %vm550_vm4, %v4521_v16, 0.0  ;;  %v3139_v37 = vsel %vm4446_vm5, %v4522_v30, 0.0  ;;  %v3145_v38 = vsel %vm4445_vm6, %v4523_v23, 0.0  ;;  %v3161_v16 = vadd.f32 %v728_v28, %v727_v33 }
  0xac   : > { %v3151_v41 = vsel %vm4444_vm7, %v4524_v24, 0.0  ;;  %4525 = vst [vmem:[#allocation39_spill] sm:$0xff] %v3156_v44  ;;  %v1162_v23 = vrot.slane %v3040_v34, 4  ;;  %v1180_v24 = vrot.slane %v3113_v63, 4  ;;  %v1216_v45 = vrot.slane %v3127_v32, 4 }
  0xad   : > { %4526 = vst [vmem:[#allocation40_spill] sm:$0xff] %v3161_v16  ;;  %v1234_v27 = vrot.slane %v3133_v22, 4  ;;  %v1252_v57 = vrot.slane %v3139_v37, 4  ;;  %v1270_v28 = vrot.slane %v3145_v38, 4  ;;  %v1288_v33 = vrot.slane %v3151_v41, 4 }
  0xae   : > { %v1163_v0 = vmax.f32 %v3040_v34, %v1162_v23  ;;  %v1181_v56 = vmax.f32 %v3113_v63, %v1180_v24  ;;  %v1199_v30 = vmax.f32 %v3121_v62, %v1198_v42  ;;  %v1217_v55 = vmax.f32 %v3127_v32, %v1216_v45 }
  0xaf   : > { %v1235_v46 = vmax.f32 %v3133_v22, %v1234_v27  ;;  %v1253_v2 = vmax.f32 %v3139_v37, %v1252_v57  ;;  %v1271_v11 = vmax.f32 %v3145_v38, %v1270_v28  ;;  %v1289_v23 = vmax.f32 %v3151_v41, %v1288_v33 }
  0xb0   : > { %v1164_v21 = vrot.slane %v1163_v0, 2  ;;  %v1182_v12 = vrot.slane %v1181_v56, 2  ;;  %v1200_v10 = vrot.slane %v1199_v30, 2  ;;  %v1218_v24 = vrot.slane %v1217_v55, 2 }
  0xb1   : > { %v1236_v17 = vrot.slane %v1235_v46, 2  ;;  %v1254_v16 = vrot.slane %v1253_v2, 2  ;;  %v1272_v5 = vrot.slane %v1271_v11, 2  ;;  %v1290_v42 = vrot.slane %v1289_v23, 2 }
  0xb2   : > { %v1165_v44 = vmax.f32 %v1163_v0, %v1164_v21  ;;  %v1183_v6 = vmax.f32 %v1181_v56, %v1182_v12  ;;  %v1201_v4 = vmax.f32 %v1199_v30, %v1200_v10  ;;  %v1219_v45 = vmax.f32 %v1217_v55, %v1218_v24 }
  0xb3   : > { %v1237_v3 = vmax.f32 %v1235_v46, %v1236_v17  ;;  %v1255_v27 = vmax.f32 %v1253_v2, %v1254_v16  ;;  %v1273_v40 = vmax.f32 %v1271_v11, %v1272_v5  ;;  %v1291_v39 = vmax.f32 %v1289_v23, %v1290_v42 }
  0xb4   : > { %v1166_v8 = vrot.slane %v1165_v44, 1  ;;  %v1184_v57 = vrot.slane %v1183_v6, 1  ;;  %v1202_v36 = vrot.slane %v1201_v4, 1  ;;  %v1220_v28 = vrot.slane %v1219_v45, 1 }
  0xb5   : > { %v1238_v35 = vrot.slane %v1237_v3, 1  ;;  %v1256_v33 = vrot.slane %v1255_v27, 1  ;;  %v1274_v21 = vrot.slane %v1273_v40, 1  ;;  %v1292_v12 = vrot.slane %v1291_v39, 1 }
  0xb6   : > { %v3180_v31 = vmax.f32 %v1165_v44, %v1166_v8  ;;  %v3182_v26 = vmax.f32 %v1183_v6, %v1184_v57  ;;  %v3184_v56 = vmax.f32 %v1201_v4, %v1202_v36  ;;  %v3186_v10 = vmax.f32 %v1219_v45, %v1220_v28 }
  0xb7   : > { %v3188_v17 = vmax.f32 %v1237_v3, %v1238_v35  ;;  %v3190_v2 = vmax.f32 %v1255_v27, %v1256_v33  ;;  %v3192_v5 = vmax.f32 %v1273_v40, %v1274_v21  ;;  %v3194_v11 = vmax.f32 %v1291_v39, %v1292_v12 }
  0xb8   : > { %v1306_v8 = vsub.f32 %v3040_v34, %v3180_v31  ;;  %v1309_v6 = vsub.f32 %v3113_v63, %v3182_v26  ;;  %v1312_v4 = vsub.f32 %v3121_v62, %v3184_v56  ;;  %v1315_v36 = vsub.f32 %v3127_v32, %v3186_v10 }
  0xb9   : > { %v1318_v3 = vsub.f32 %v3133_v22, %v3188_v17  ;;  %v1321_v35 = vsub.f32 %v3139_v37, %v3190_v2  ;;  %v1324_v39 = vsub.f32 %v3145_v38, %v3192_v5  ;;  %v1327_v40 = vsub.f32 %v3151_v41, %v3194_v11 }
  0xba   : > { %v1330_v44 = vmul.f32 1.442695, %v1306_v8  ;;  %v1336_v46 = vmul.f32 1.442695, %v1309_v6  ;;  %v1342_v55 = vmul.f32 1.442695, %v1312_v4  ;;  %v1594_v0 = vmul.f32 %v3067_v47, %v3040_v34 }
  0xbb   : > { %v1348_v16 = vmul.f32 1.442695, %v1315_v36  ;;  %v1354_v30 = vmul.f32 1.442695, %v1318_v3  ;;  %v1360_v23 = vmul.f32 1.442695, %v1321_v35  ;;  %v1597_v45 = vmul.f32 %v3069_v48, %v3113_v63 }
  0xbc   : > { %2336 = vpow2.f32 %v1330_v44  ;;  %v1366_v24 = vmul.f32 1.442695, %v1324_v39  ;;  %v1372_v42 = vmul.f32 1.442695, %v1327_v40  ;;  %v1600_v27 = vmul.f32 %v3073_v49, %v3121_v62 }
  0xbd   : > { %2338 = vpow2.f32 %v1336_v46  ;;  %v1603_v57 = vmul.f32 %v3075_v50, %v3127_v32  ;;  %v1606_v28 = vmul.f32 %v3077_v51, %v3133_v22  ;;  %v1609_v34 = vmul.f32 %v3079_v52, %v3139_v37 }
  0xbe   : > { %2340 = vpow2.f32 %v1342_v55  ;;  %v1612_v47 = vmul.f32 %v3081_v53, %v3145_v38  ;;  %v1615_v48 = vmul.f32 %v3083_v54, %v3151_v41  ;;  %v1618_v63 = vrot.slane %v1594_v0, 4 }
  0xbf   : > { %2342 = vpow2.f32 %v1348_v16  ;;  %v1636_v33 = vrot.slane %v1597_v45, 4  ;;  %v1654_v49 = vrot.slane %v1600_v27, 4  ;;  %v1672_v62 = vrot.slane %v1603_v57, 4 }
  0xc0   : > { %2344 = vpow2.f32 %v1354_v30  ;;  %v1690_v50 = vrot.slane %v1606_v28, 4  ;;  %v1619_v32 = vadd.f32 %v1618_v63, %v1594_v0  ;;  %v1708_v51 = vrot.slane %v1609_v34, 4 }
  0xc1   : > { %2346 = vpow2.f32 %v1360_v23  ;;  %v1637_v21 = vadd.f32 %v1636_v33, %v1597_v45  ;;  %v1655_v22 = vadd.f32 %v1654_v49, %v1600_v27  ;;  %v1673_v52 = vadd.f32 %v1672_v62, %v1603_v57 }
  0xc2   : > { %2348 = vpow2.f32 %v1366_v24  ;;  %v1691_v37 = vadd.f32 %v1690_v50, %v1606_v28  ;;  %v1620_v53 = vrot.slane %v1619_v32, 2  ;;  %v1709_v12 = vadd.f32 %v1708_v51, %v1609_v34 }
  0xc3   : > { %2350 = vpow2.f32 %v1372_v42  ;;  %v1638_v38 = vrot.slane %v1637_v21, 2  ;;  %v1656_v8 = vrot.slane %v1655_v22, 2  ;;  %v1674_v54 = vrot.slane %v1673_v52, 2 }
  0xc4   : > { %v1692_v41 = vrot.slane %v1691_v37, 2  ;;  %v1726_v6 = vrot.slane %v1612_v47, 4  ;;  %v1621_v4 = vadd.f32 %v1620_v53, %v1619_v32  ;;  %v1710_v3 = vrot.slane %v1709_v12, 2 }
  0xc5   : > { %v1639_v36 = vadd.f32 %v1638_v38, %v1637_v21  ;;  %v1744_v35 = vrot.slane %v1615_v48, 4  ;;  %v836_v39 = vrot.slane %v3154_v43, 1  ;;  %v1657_v40 = vadd.f32 %v1656_v8, %v1655_v22 }
  0xc6   : > { %v1675_v44 = vadd.f32 %v1674_v54, %v1673_v52  ;;  %v1727_v46 = vadd.f32 %v1726_v6, %v1612_v47  ;;  %v4527_v55 = vrot.slane %v3101_v29, 1  ;;  %v1622_v30 = vrot.slane %v1621_v4, 1 }
  0xc7   : > { %v3234_v0 = vadd.f32 %v1692_v41, %v1691_v37  ;;  %v1745_v23 = vadd.f32 %v1744_v35, %v1615_v48  ;;  %v4529_v24 = vrot.slane %v3103_v58, 1  ;;  %v1640_v45 = vrot.slane %v1639_v36, 1 }
  0xc8   : > { %v3232_v16 = vadd.f32 %v4527_v55, %v3101_v29  ;;  %v3241_v27 = vadd.f32 %v1710_v3, %v1709_v12  ;;  %v1728_v57 = vrot.slane %v1727_v46, 2  ;;  %v4531_v34 = vrot.slane %v3105_v59, 1 }
  0xc9   : > { %v3239_v42 = vadd.f32 %v4529_v24, %v3103_v58  ;;  %v2337_v28 = vpop.eup %2336  ;;  %v4533_v29 = vrot.slane %v3107_v60, 1  ;;  %v1658_v48 = vrot.slane %v1657_v40, 1  ;;  %v1676_v33 = vrot.slane %v1675_v44, 1 }
  0xca   : > { %4528 = vst [vmem:[#allocation41_spill] sm:$0xff] %v3232_v16  ;;  %v3246_v47 = vadd.f32 %v4531_v34, %v3105_v59  ;;  %v2339_v49 = vpop.eup %2338  ;;  %v4535_v58 = vrot.slane %v3115_v61, 1  ;;  %v3259_v50 = vadd.f32 %v836_v39, %v3154_v43  ;;  %v1378_v32 = vrot.slane %v2337_v28, 4 }
  0xcb   : > { %4530 = vst [vmem:[#allocation42_spill] sm:$0xff] %v3239_v42  ;;  %v3251_v63 = vadd.f32 %v4533_v29, %v3107_v60  ;;  %v1746_v21 = vrot.slane %v1745_v23, 2  ;;  %v2341_v59 = vpop.eup %2340  ;;  %v1396_v51 = vrot.slane %v2339_v49, 4  ;;  %v3261_v22 = vadd.f32 %v1622_v30, %v1621_v4 }
  0xcc   : > { %4532 = vst [vmem:[#allocation43_spill] sm:$0xff] %v3246_v47  ;;  %v3256_v62 = vadd.f32 %v4535_v58, %v3115_v61  ;;  %4537 = vst [vmem:[#allocation46_spill] sm:$0xff] %v3259_v50  ;;  %v1694_v60 = vrot.slane %v3234_v0, 1  ;;  %v3264_v52 = vadd.f32 %v1728_v57, %v1727_v46  ;;  %v2343_v37 = vpop.eup %2342  ;;  %v1379_v53 = vadd.f32 %v2337_v28, %v1378_v32 }
  0xcd   : > { %4534 = vst [vmem:[#allocation44_spill] sm:$0xff] %v3251_v63  ;;  %v1414_v38 = vrot.slane %v2341_v59, 4  ;;  %v3266_v12 = vadd.f32 %v1640_v45, %v1639_v36  ;;  %v1712_v61 = vrot.slane %v3241_v27, 1  ;;  %v2345_v8 = vpop.eup %2344  ;;  %v1397_v43 = vadd.f32 %v2339_v49, %v1396_v51 }
  0xce   : > { %4536 = vst [vmem:[#allocation45_spill] sm:$0xff] %v3256_v62  ;;  %v1432_v54 = vrot.slane %v2343_v37, 4  ;;  %v3269_v41 = vadd.f32 %v1658_v48, %v1657_v40  ;;  %v3271_v6 = vadd.f32 %v1676_v33, %v1675_v44  ;;  %v2347_v4 = vpop.eup %2346  ;;  %v1380_v3 = vrot.slane %v1379_v53, 2 }
  0xcf   : > { %v1415_v35 = vadd.f32 %v2341_v59, %v1414_v38  ;;  %v1450_v39 = vrot.slane %v2345_v8, 4  ;;  %v1747_v46 = vadd.f32 %v1746_v21, %v1745_v23  ;;  %v2349_v55 = vpop.eup %2348  ;;  %v1398_v30 = vrot.slane %v1397_v43, 2 }
  0xd0   : > { %4538 = vst [vmem:[#allocation47_spill] sm:$0xff] %v3271_v6  ;;  %v1433_v24 = vadd.f32 %v2343_v37, %v1432_v54  ;;  %v1468_v57 = vrot.slane %v2347_v4, 4  ;;  %v1730_v36 = vrot.slane %v3264_v52, 1  ;;  %v2351_v45 = vpop.eup %2350  ;;  %v1381_v28 = vadd.f32 %v1380_v3, %v1379_v53 }
  0xd1   : > { %v1416_v34 = vrot.slane %v1415_v35, 2  ;;  %v1451_v29 = vadd.f32 %v2345_v8, %v1450_v39  ;;  %v1486_v49 = vrot.slane %v2349_v55, 4  ;;  %v1399_v40 = vadd.f32 %v1398_v30, %v1397_v43 }
  0xd2   : > { %v1434_v48 = vrot.slane %v1433_v24, 2  ;;  %v1469_v44 = vadd.f32 %v2347_v4, %v1468_v57  ;;  %v1504_v33 = vrot.slane %v2351_v45, 4  ;;  %v1382_v58 = vrot.slane %v1381_v28, 1 }
  0xd3   : > { %v1417_v32 = vadd.f32 %v1416_v34, %v1415_v35  ;;  %v1452_v59 = vrot.slane %v1451_v29, 2  ;;  %v1487_v51 = vadd.f32 %v2349_v55, %v1486_v49  ;;  %v1400_v23 = vrot.slane %v1399_v40, 1 }
  0xd4   : > { %v1435_v21 = vadd.f32 %v1434_v48, %v1433_v24  ;;  %v1470_v38 = vrot.slane %v1469_v44, 2  ;;  %v1505_v37 = vadd.f32 %v2351_v45, %v1504_v33  ;;  %v1383_v54 = vadd.f32 %v1382_v58, %v1381_v28 }
  0xd5   : > { %v1418_v50 = vrot.slane %v1417_v32, 1  ;;  %v1453_v62 = vadd.f32 %v1452_v59, %v1451_v29  ;;  %v1488_v6 = vrot.slane %v1487_v51, 2  ;;  %v1401_v53 = vadd.f32 %v1400_v23, %v1399_v40  ;;  %v4542_v59 = vld [vmem:[#allocation35_spill] sm:$0xff]  ;;  %v4543_v23 = vld [vmem:[#allocation36_spill] sm:$0xff] }
  0xd6   : > { %v1436_v3 = vrot.slane %v1435_v21, 1  ;;  %v1471_v8 = vadd.f32 %v1470_v38, %v1469_v44  ;;  %v1506_v39 = vrot.slane %v1505_v37, 2  ;;  %2352 = vlog2.f32 %v1383_v54  ;;  %v4544_v38 = vld [vmem:[#allocation37_spill] sm:$0xff]  ;;  %v4545_v54 = vld [vmem:[#allocation38_spill] sm:$0xff] }
  0xd7   : > { %v1419_v43 = vadd.f32 %v1418_v50, %v1417_v32  ;;  %v1454_v30 = vrot.slane %v1453_v62, 1  ;;  %v1489_v4 = vadd.f32 %v1488_v6, %v1487_v51  ;;  %2354 = vlog2.f32 %v1401_v53 }
  0xd8   : > { %v1437_v57 = vadd.f32 %v1436_v3, %v1435_v21  ;;  %v1472_v35 = vrot.slane %v1471_v8, 1  ;;  %v1507_v34 = vadd.f32 %v1506_v39, %v1505_v37  ;;  %v1748_v45 = vrot.slane %v1747_v46, 1 }
  0xd9   : > { %v1455_v55 = vadd.f32 %v1454_v30, %v1453_v62  ;;  %v1490_v24 = vrot.slane %v1489_v4, 1  ;;  %2356 = vlog2.f32 %v1419_v43  ;;  %v3275_v29 = vadd.f32 %v1694_v60, %v3234_v0  ;;  %v4553_v0 = vld [vmem:[#allocation40_spill] sm:$0xff] }
  0xda   : > { %v1473_v28 = vadd.f32 %v1472_v35, %v1471_v8  ;;  %v1508_v49 = vrot.slane %v1507_v34, 1  ;;  %2358 = vlog2.f32 %v1437_v57  ;;  %v3278_v50 = vadd.f32 %v1712_v61, %v3241_v27  ;;  %v4540_v61 = vld [vmem:[#allocation33_spill] sm:$0xff] }
  0xdb   : > { %v1491_v40 = vadd.f32 %v1490_v24, %v1489_v4  ;;  %2360 = vlog2.f32 %v1455_v55  ;;  %v609_v6 = vunpack.c.h.bf16 %v2983_v9  ;;  %v612_v62 = vunpack.c.h.bf16 %v2995_v13  ;;  %v4546_v24 = vld [vmem:[#allocation27_spill] sm:$0xff] }
  0xdc   : > { %v1509_v48 = vadd.f32 %v1508_v49, %v1507_v34  ;;  %2362 = vlog2.f32 %v1473_v28  ;;  %v615_v44 = vunpack.c.h.bf16 %v2998_v14  ;;  %v3284_v33 = vadd.f32 %v1730_v36, %v3264_v52  ;;  %v4541_v36 = vld [vmem:[#allocation34_spill] sm:$0xff] }
  0xdd   : > { %2364 = vlog2.f32 %v1491_v40  ;;  %v3286_v58 = vadd.f32 %v1748_v45, %v1747_v46  ;;  %v4539_v9 = vunpack.c.h.bf16 %v2977_v7  ;;  %v659_v14 = vunpack.c.1.s8 %v3016_v20 }
  0xde   : > { %2366 = vlog2.f32 %v1509_v48  ;;  %v662_v52 = vunpack.c.1.s8 %v3024_v25  ;;  %v665_v46 = vunpack.c.1.s8 %v4540_v61  ;;  %v668_v32 = vunpack.c.1.s8 %v4541_v36 }
  0xdf   : > { %v3295_v13 = vsel %vm546_vm0, %v4539_v9, 0.0  ;;  %v671_v51 = vunpack.c.1.s8 %v4542_v59  ;;  %v674_v21 = vunpack.c.1.s8 %v4543_v23  ;;  %v677_v37 = vunpack.c.1.s8 %v4544_v38 }
  0xe0   : > { %v680_v7 = vunpack.c.1.s8 %v4545_v54  ;;  %v3305_v53 = vcvt.s32.f32 %v659_v14  ;;  %v3307_v3 = vcvt.s32.f32 %v662_v52  ;;  %v3309_v8 = vcvt.s32.f32 %v665_v46  ;;  %v4554_v46 = vld [vmem:[#allocation31_spill] sm:$0xff] }
  0xe1   : > { %v3311_v20 = vcvt.s32.f32 %v668_v32  ;;  %v3313_v25 = vcvt.s32.f32 %v671_v51  ;;  %v3315_v39 = vcvt.s32.f32 %v674_v21  ;;  %v3317_v43 = vcvt.s32.f32 %v677_v37 }
  0xe2   : > { %v3319_v30 = vcvt.s32.f32 %v680_v7  ;;  %v712_v4 = vrot.slane %v3305_v53, 4  ;;  %v730_v57 = vrot.slane %v3307_v3, 4  ;;  %v748_v35 = vrot.slane %v3309_v8, 4 }
  0xe3   : > { %v766_v34 = vrot.slane %v3311_v20, 4  ;;  %v2353_v55 = vpop.eup %2352  ;;  %v4547_v45 = vunpack.c.h.bf16 %v4546_v24  ;;  %v3333_v48 = vsel %vm548_vm2, %v609_v6, 0.0  ;;  %v784_v9 = vrot.slane %v3313_v25, 4 }
  0xe4   : > { %v802_v14 = vrot.slane %v3315_v39, 4  ;;  %v2355_v52 = vpop.eup %2354  ;;  %v1523_v61 = vmul.f32 0.6931472, %v2353_v55  ;;  %v3339_v36 = vsel %vm549_vm3, %v612_v62, 0.0  ;;  %v3343_v59 = vsel %vm550_vm4, %v615_v44, 0.0 }
  0xe5   : > { %v3329_v49 = vsel %vm547_vm1, %v4547_v45, 0.0  ;;  %v713_v51 = vadd.f32 %v712_v4, %v3305_v53  ;;  %vm4488_vm11 = vcmask 1044484   ;;  %v1529_v6 = vmul.f32 0.6931472, %v2355_v52 }
  0xe6   : > { %v2357_v23 = vpop.eup %2356  ;;  %v731_v21 = vadd.f32 %v730_v57, %v3307_v3  ;;  %vm1114_vm12 = vcmask 1045509   ;;  %v1570_v62 = vadd.f32 %v1523_v61, %v3180_v31  ;;  %v749_v55 = vadd.f32 %v748_v35, %v3309_v8  ;;  %v4552_v31 = vld [vmem:[#allocation39_spill] sm:$0xff] }
  0xe7   : > { %v2359_v54 = vpop.eup %2358  ;;  %v1535_v7 = vmul.f32 0.6931472, %v2357_v23  ;;  %v3352_v44 = vadd.f32 %v766_v34, %v3311_v20  ;;  %vm4479_vm13 = vcmask 1046534   ;;  %v1573_v45 = vadd.f32 %v1529_v6, %v3182_v26 }
  0xe8   : > { %v2361_v4 = vpop.eup %2360  ;;  %v1541_v24 = vmul.f32 0.6931472, %v2359_v54  ;;  %v785_v57 = vadd.f32 %v784_v9, %v3313_v25  ;;  %v803_v52 = vadd.f32 %v802_v14, %v3315_v39  ;;  %vm4447_vm14 = vcmask 1047559  }
  0xe9   : > { %v2363_v60 = vpop.eup %2362  ;;  %v1547_v37 = vmul.f32 0.6931472, %v2361_v4  ;;  %v1576_v23 = vadd.f32 %v1535_v7, %v3184_v56  ;;  %v1765_v61 = vmul.f32 %v1570_v62, %v4552_v31  ;;  %v714_v35 = vrot.slane %v713_v51, 2 }
  0xea   : > { %v2365_v38 = vpop.eup %2364  ;;  %v1553_v34 = vmul.f32 0.6931472, %v2363_v60  ;;  %v1579_v27 = vadd.f32 %v1541_v24, %v3186_v10  ;;  %v1768_v54 = vmul.f32 %v1573_v45, %v4553_v0  ;;  %v732_v32 = vrot.slane %v731_v21, 2  ;;  %v4555_v45 = vld [vmem:[#allocation47_spill] sm:$0xff] }
  0xeb   : > { %v2367_v26 = vpop.eup %2366  ;;  %v1559_v6 = vmul.f32 0.6931472, %v2365_v38  ;;  %v1582_v9 = vadd.f32 %v1547_v37, %v3188_v17  ;;  %v1771_v14 = vmul.f32 %v1576_v23, %v3232_v16  ;;  %v1789_v4 = vsub.f32 %v1765_v61, %v3261_v22  ;;  %v4556_v61 = vld [vmem:[#allocation45_spill] sm:$0xff] }
  0xec   : > { %vm532_vm15 = vcmp.lt.s32.totalorder %v4554_v46, 10  ;;  %v1565_v56 = vmul.f32 0.6931472, %v2367_v26  ;;  %v1585_v7 = vadd.f32 %v1553_v34, %v3190_v2  ;;  %v1774_v60 = vmul.f32 %v1579_v27, %v3239_v42 }
  0xed   : > { %v1792_v10 = vsub.f32 %v1768_v54, %v3266_v12  ;;  %v1588_v62 = vadd.f32 %v1559_v6, %v3192_v5  ;;  %v1777_v38 = vmul.f32 %v1582_v9, %v3246_v47  ;;  %v1795_v17 = vsub.f32 %v1771_v14, %v3269_v41  ;;  %v4557_v54 = vld [vmem:[#allocation46_spill] sm:$0xff] }
  0xee   : > { %v715_v37 = vadd.f32 %v714_v35, %v713_v51  ;;  %v1591_v24 = vadd.f32 %v1565_v56, %v3194_v11  ;;  %v1780_v22 = vmul.f32 %v1585_v7, %v3251_v63  ;;  %v1798_v23 = vsub.f32 %v1774_v60, %v4555_v45  ;;  %v4561_v60 = vld [vmem:[#allocation29_spill] sm:$0xff] }
  0xef   : > { %v1837_v2 = vsel %vm1102_vm8, %v1792_v10, %v1789_v4  ;;  %v1783_v27 = vmul.f32 %v1588_v62, %v4556_v61  ;;  %v1801_v12 = vsub.f32 %v1777_v38, %v3275_v29  ;;  %v733_v34 = vadd.f32 %v732_v32, %v731_v21  ;;  %v4559_v4 = vld [vmem:[#allocation28_spill] sm:$0xff] }
  0xf0   : > { %v1838_v5 = vsel %vm1105_vm9, %v1795_v17, %v1837_v2  ;;  %v1786_v26 = vmul.f32 %v1591_v24, %v4557_v54  ;;  %v1804_v41 = vsub.f32 %v1780_v22, %v3278_v50  ;;  %v750_v11 = vrot.slane %v749_v55, 2  ;;  %v4565_v2 = vld [vmem:[#allocation30_spill] sm:$0xff] }
  0xf1   : > { %v1839_v51 = vsel %vm1108_vm10, %v1798_v23, %v1838_v5  ;;  %v1807_v35 = vsub.f32 %v1783_v27, %v3284_v33  ;;  %v716_v9 = vrot.slane %v715_v37, 1  ;;  %v768_v14 = vrot.slane %v3352_v44, 2 }
  0xf2   : > { %v1840_v6 = vsel %vm4488_vm11, %v1801_v12, %v1839_v51  ;;  %v1810_v29 = vsub.f32 %v1786_v26, %v3286_v58  ;;  %v4558_v21 = vunpack.c.h.bf16 %v3001_v15  ;;  %v786_v56 = vrot.slane %v785_v57, 2 }
  0xf3   : > { %v1841_v32 = vsel %vm1114_vm12, %v1804_v41, %v1840_v6  ;;  %v4560_v33 = vunpack.c.h.bf16 %v3010_v18  ;;  %v734_v62 = vrot.slane %v733_v34, 1  ;;  %v804_v38 = vrot.slane %v803_v52, 2 }
  0xf4   : > { %v3393_v50 = vsel %vm4446_vm5, %v4558_v21, 0.0  ;;  %v1842_v7 = vsel %vm4479_vm13, %v1807_v35, %v1841_v32  ;;  %v3403_v17 = vadd.f32 %v750_v11, %v749_v55  ;;  %v4562_v15 = vrot.slane %v3317_v43, 4 }
  0xf5   : > { %v3400_v10 = vsel %vm4445_vm6, %v4560_v33, 0.0  ;;  %v1843_v58 = vsel %vm4447_vm14, %v1810_v29, %v1842_v7  ;;  %v4563_v22 = vrot.slane %v3319_v30, 4  ;;  %v4564_v23 = vunpack.c.h.bf16 %v3013_v19 }
  0xf6   : > { %v821_v24 = vadd.f32 %v4562_v15, %v3317_v43  ;;  %v1861_v18 = vsel %vm532_vm15, %v1843_v58, 0.0  ;;  %v3419_v12 = vadd.f32 %v716_v9, %v715_v37  ;;  %v3422_v55 = vadd.f32 %v768_v14, %v3352_v44 }
  0xf7   : > { %v839_v45 = vadd.f32 %v4563_v22, %v3319_v30  ;;  %v3417_v27 = vsel %vm4444_vm7, %v4564_v23, 0.0  ;;  %v3424_v5 = vadd.f32 %v786_v56, %v785_v57  ;;  %v3426_v26 = vadd.f32 %v804_v38, %v803_v52  ;;  %1867 = vst [vmem:[%s3434_s23] sm:$0xff] %v1861_v18 }
  0xf8   : > { %4566 = vst [vmem:[#allocation33_spill] sm:$0xff] %v3419_v12  ;;  %v822_v41 = vrot.slane %v821_v24, 2  ;;  %v3428_v51 = vadd.f32 %v734_v62, %v733_v34  ;;  %v1168_v11 = vrot.slane %v3295_v13, 4  ;;  %v1186_v19 = vrot.slane %v3329_v49, 4 }
  0xf9   : > { %v1204_v35 = vrot.slane %v3333_v48, 4  ;;  %v840_v57 = vrot.slane %v839_v45, 2  ;;  %v1222_v52 = vrot.slane %v3339_v36, 4  ;;  %v1240_v56 = vrot.slane %v3343_v59, 4 }
  0xfa   : > { %4567 = vst [vmem:[#allocation34_spill] sm:$0xff] %v3428_v51  ;;  %v3438_v37 = vadd.f32 %v822_v41, %v821_v24  ;;  %v1169_v6 = vmax.f32 %v3295_v13, %v1168_v11  ;;  %v1187_v9 = vmax.f32 %v3329_v49, %v1186_v19  ;;  %v1258_v38 = vrot.slane %v3393_v50, 4 }
  0xfb   : > { %v1205_v14 = vmax.f32 %v3333_v48, %v1204_v35  ;;  %v1223_v21 = vmax.f32 %v3339_v36, %v1222_v52  ;;  %v3451_v15 = vadd.f32 %v840_v57, %v839_v45  ;;  %v1241_v22 = vmax.f32 %v3343_v59, %v1240_v56 }
  0xfc   : > { %v1170_v7 = vrot.slane %v1169_v6, 2  ;;  %v1188_v33 = vrot.slane %v1187_v9, 2  ;;  %v1259_v11 = vmax.f32 %v3393_v50, %v1258_v38  ;;  %v1276_v52 = vrot.slane %v3400_v10, 4 }
  0xfd   : > { %v1206_v62 = vrot.slane %v1205_v14, 2  ;;  %v1224_v24 = vrot.slane %v1223_v21, 2  ;;  %v1242_v35 = vrot.slane %v1241_v22, 2  ;;  %v1294_v32 = vrot.slane %v3417_v27, 4 }
  0xfe   : > { %v1171_v18 = vmax.f32 %v1169_v6, %v1170_v7  ;;  %v1189_v23 = vmax.f32 %v1187_v9, %v1188_v33  ;;  %v1260_v58 = vrot.slane %v1259_v11, 2  ;;  %v1277_v54 = vmax.f32 %v3400_v10, %v1276_v52 }
  0xff   : > { %v1207_v41 = vmax.f32 %v1205_v14, %v1206_v62  ;;  %v1225_v19 = vmax.f32 %v1223_v21, %v1224_v24  ;;  %v1243_v57 = vmax.f32 %v1241_v22, %v1242_v35  ;;  %v1295_v6 = vmax.f32 %v3417_v27, %v1294_v32 }
 0x100   : > { %v1172_v29 = vrot.slane %v1171_v18, 1  ;;  %v1190_v34 = vrot.slane %v1189_v23, 1  ;;  %v1261_v56 = vmax.f32 %v1259_v11, %v1260_v58  ;;  %v1278_v62 = vrot.slane %v1277_v54, 2 }
 0x101   : > { %v1208_v44 = vrot.slane %v1207_v41, 1  ;;  %v1226_v45 = vrot.slane %v1225_v19, 1  ;;  %v1244_v33 = vrot.slane %v1243_v57, 1  ;;  %v1296_v38 = vrot.slane %v1295_v6, 2 }
 0x102   : > { %v3459_v9 = vmax.f32 %v1171_v18, %v1172_v29  ;;  %v3461_v14 = vmax.f32 %v1189_v23, %v1190_v34  ;;  %v1262_v24 = vrot.slane %v1261_v56, 1 }
 0x103   : > { %v3463_v21 = vmax.f32 %v1207_v41, %v1208_v44  ;;  %v3465_v7 = vmax.f32 %v1225_v19, %v1226_v45  ;;  %v3473_v34 = vmax.f32 %v1243_v57, %v1244_v33  ;;  %v1279_v44 = vmax.f32 %v1277_v54, %v1278_v62 }
 0x104   : > { %v1307_v22 = vsub.f32 %v3295_v13, %v3459_v9  ;;  %v1310_v35 = vsub.f32 %v3329_v49, %v3461_v14  ;;  %v1297_v32 = vmax.f32 %v1295_v6, %v1296_v38  ;;  %v3477_v18 = vmax.f32 %v1261_v56, %v1262_v24 }
 0x105   : > { %v1313_v29 = vsub.f32 %v3333_v48, %v3463_v21  ;;  %v1316_v58 = vsub.f32 %v3339_v36, %v3465_v7  ;;  %v1280_v19 = vrot.slane %v1279_v44, 1  ;;  %v1319_v45 = vsub.f32 %v3343_v59, %v3473_v34 }
 0x106   : > { %v1332_v23 = vmul.f32 1.442695, %v1307_v22  ;;  %v1338_v41 = vmul.f32 1.442695, %v1310_v35  ;;  %v1298_v52 = vrot.slane %v1297_v32, 1  ;;  %v1322_v57 = vsub.f32 %v3393_v50, %v3477_v18 }
 0x107   : > { %v1344_v11 = vmul.f32 1.442695, %v1313_v29  ;;  %v1350_v61 = vmul.f32 1.442695, %v1316_v58  ;;  %v1595_v54 = vmul.f32 %v3305_v53, %v3295_v13  ;;  %v1598_v6 = vmul.f32 %v3307_v3, %v3329_v49 }
 0x108   : > { %2368 = vpow2.f32 %v1332_v23  ;;  %v3487_v56 = vmax.f32 %v1279_v44, %v1280_v19  ;;  %v3489_v33 = vmax.f32 %v1297_v32, %v1298_v52  ;;  %v1356_v62 = vmul.f32 1.442695, %v1319_v45 }
 0x109   : > { %2370 = vpow2.f32 %v1338_v41  ;;  %v1362_v38 = vmul.f32 1.442695, %v1322_v57  ;;  %v1601_v24 = vmul.f32 %v3309_v8, %v3333_v48  ;;  %v1604_v22 = vmul.f32 %v3311_v20, %v3339_v36 }
 0x10a   : > { %2372 = vpow2.f32 %v1344_v11  ;;  %v1325_v13 = vsub.f32 %v3400_v10, %v3487_v56  ;;  %v1328_v53 = vsub.f32 %v3417_v27, %v3489_v33  ;;  %v1607_v3 = vmul.f32 %v3313_v25, %v3343_v59 }
 0x10b   : > { %2374 = vpow2.f32 %v1350_v61  ;;  %v1610_v49 = vmul.f32 %v3315_v39, %v3393_v50  ;;  %v1613_v8 = vmul.f32 %v3317_v43, %v3400_v10  ;;  %v1616_v20 = vmul.f32 %v3319_v30, %v3417_v27 }
 0x10c   : > { %2376 = vpow2.f32 %v1356_v62  ;;  %v1368_v48 = vmul.f32 1.442695, %v1325_v13  ;;  %v1374_v36 = vmul.f32 1.442695, %v1328_v53  ;;  %v1624_v35 = vrot.slane %v1595_v54, 4 }
 0x10d   : > { %2378 = vpow2.f32 %v1362_v38  ;;  %v1642_v29 = vrot.slane %v1598_v6, 4  ;;  %v1660_v44 = vrot.slane %v1601_v24, 4  ;;  %v1678_v61 = vrot.slane %v1604_v22, 4 }
 0x10e   : > { %v1696_v32 = vrot.slane %v1607_v3, 4  ;;  %2380 = vpow2.f32 %v1368_v48  ;;  %v1625_v25 = vadd.f32 %v1624_v35, %v1595_v54  ;;  %v1714_v59 = vrot.slane %v1610_v49, 4 }
 0x10f   : > { %v1732_v58 = vrot.slane %v1613_v8, 4  ;;  %2382 = vpow2.f32 %v1374_v36  ;;  %v1643_v39 = vadd.f32 %v1642_v29, %v1598_v6  ;;  %v1661_v50 = vadd.f32 %v1660_v44, %v1601_v24 }
 0x110   : > { %v1679_v23 = vadd.f32 %v1678_v61, %v1604_v22  ;;  %v1626_v43 = vrot.slane %v1625_v25, 2  ;;  %v1697_v10 = vadd.f32 %v1696_v32, %v1607_v3  ;;  %v1715_v41 = vadd.f32 %v1714_v59, %v1610_v49 }
 0x111   : > { %v1733_v30 = vadd.f32 %v1732_v58, %v1613_v8  ;;  %v842_v27 = vrot.slane %v3451_v15, 1  ;;  %v1644_v11 = vrot.slane %v1643_v39, 2  ;;  %v1662_v19 = vrot.slane %v1661_v50, 2 }
 0x112   : > { %v1680_v52 = vrot.slane %v1679_v23, 2  ;;  %v1627_v45 = vadd.f32 %v1626_v43, %v1625_v25  ;;  %v1698_v57 = vrot.slane %v1697_v10, 2  ;;  %v1716_v62 = vrot.slane %v1715_v41, 2 }
 0x113   : > { %v1750_v38 = vrot.slane %v1616_v20, 4  ;;  %v4568_v54 = vrot.slane %v3403_v17, 1  ;;  %v4570_v6 = vrot.slane %v3422_v55, 1  ;;  %v3518_v22 = vadd.f32 %v1644_v11, %v1643_v39 }
 0x114   : > { %v1734_v53 = vrot.slane %v1733_v30, 2  ;;  %v4572_v49 = vrot.slane %v3424_v5, 1  ;;  %v4574_v48 = vrot.slane %v3426_v26, 1  ;;  %v3532_v35 = vadd.f32 %v1680_v52, %v1679_v23 }
 0x115   : > { %v3511_v13 = vadd.f32 %v4568_v54, %v3403_v17  ;;  %v3516_v24 = vadd.f32 %v4570_v6, %v3422_v55  ;;  %v2369_v3 = vpop.eup %2368  ;;  %v3530_v17 = vadd.f32 %v1662_v19, %v1661_v50  ;;  %v4576_v29 = vrot.slane %v3438_v37, 1 }
 0x116   : > { %v3523_v8 = vadd.f32 %v4572_v49, %v3424_v5  ;;  %v3528_v36 = vadd.f32 %v4574_v48, %v3426_v26  ;;  %v2371_v55 = vpop.eup %2370  ;;  %v3540_v61 = vadd.f32 %v842_v27, %v3451_v15  ;;  %v1384_v5 = vrot.slane %v2369_v3, 4 }
 0x117   : > { %4569 = vst [vmem:[#allocation35_spill] sm:$0xff] %v3511_v13  ;;  %4571 = vst [vmem:[#allocation36_spill] sm:$0xff] %v3516_v24  ;;  %v3537_v44 = vadd.f32 %v4576_v29, %v3438_v37  ;;  %v1628_v32 = vrot.slane %v1627_v45, 1  ;;  %v2373_v25 = vpop.eup %2372  ;;  %v1402_v59 = vrot.slane %v2371_v55, 4  ;;  %v3542_v58 = vadd.f32 %v1698_v57, %v1697_v10 }
 0x118   : > { %4573 = vst [vmem:[#allocation37_spill] sm:$0xff] %v3523_v8  ;;  %4575 = vst [vmem:[#allocation38_spill] sm:$0xff] %v3528_v36  ;;  %v3544_v26 = vadd.f32 %v1716_v62, %v1715_v41  ;;  %v1751_v39 = vadd.f32 %v1750_v38, %v1616_v20  ;;  %v2375_v50 = vpop.eup %2374  ;;  %v1385_v23 = vadd.f32 %v2369_v3, %v1384_v5  ;;  %v1420_v43 = vrot.slane %v2373_v25, 4 }
 0x119   : > { %4577 = vst [vmem:[#allocation27_spill] sm:$0xff] %v3537_v44  ;;  %4578 = vst [vmem:[#allocation23_spill] sm:$0xff] %v3540_v61  ;;  %v3547_v19 = vadd.f32 %v1734_v53, %v1733_v30  ;;  %v2377_v37 = vpop.eup %2376  ;;  %v1403_v52 = vadd.f32 %v2371_v55, %v1402_v59  ;;  %v1438_v15 = vrot.slane %v2375_v50, 4  ;;  %v3551_v62 = vadd.f32 %v1628_v32, %v1627_v45 }
 0x11a   : > { %v2379_v6 = vpop.eup %2378  ;;  %v1386_v10 = vrot.slane %v1385_v23, 2  ;;  %v1421_v57 = vadd.f32 %v2373_v25, %v1420_v43  ;;  %v1456_v41 = vrot.slane %v2377_v37, 4  ;;  %v1752_v29 = vrot.slane %v1751_v39, 2 }
 0x11b   : > { %v1404_v20 = vrot.slane %v1403_v52, 2  ;;  %v1439_v38 = vadd.f32 %v2375_v50, %v1438_v15  ;;  %v1474_v3 = vrot.slane %v2379_v6, 4  ;;  %v2381_v30 = vpop.eup %2380 }
 0x11c   : > { %v1387_v53 = vadd.f32 %v1386_v10, %v1385_v23  ;;  %v1422_v48 = vrot.slane %v1421_v57, 2  ;;  %v1457_v55 = vadd.f32 %v2377_v37, %v1456_v41  ;;  %v2383_v5 = vpop.eup %2382  ;;  %v1492_v11 = vrot.slane %v2381_v30, 4 }
 0x11d   : > { %v1405_v59 = vadd.f32 %v1404_v20, %v1403_v52  ;;  %v1440_v27 = vrot.slane %v1439_v38, 2  ;;  %v1475_v54 = vadd.f32 %v2379_v6, %v1474_v3  ;;  %v1510_v45 = vrot.slane %v2383_v5, 4 }
 0x11e   : > { %v1388_v63 = vrot.slane %v1387_v53, 1  ;;  %v1423_v25 = vadd.f32 %v1422_v48, %v1421_v57  ;;  %v1458_v43 = vrot.slane %v1457_v55, 2  ;;  %v1493_v15 = vadd.f32 %v2381_v30, %v1492_v11 }
 0x11f   : > { %v1406_v32 = vrot.slane %v1405_v59, 1  ;;  %v1441_v47 = vadd.f32 %v1440_v27, %v1439_v38  ;;  %v1476_v50 = vrot.slane %v1475_v54, 2  ;;  %v1511_v23 = vadd.f32 %v2383_v5, %v1510_v45  ;;  %v578_v38 = vld [vmem:[%s2942_s14] sm:$0xff]  ;;  %v579_v5 = vld [vmem:[%s2942_s14 + $0x8] sm:$0xf]  ;;  %s2556_s14 = scalar_lea.vmem %s4094_s28, 384 }
 0x120   : > { %v1389_v31 = vadd.f32 %v1388_v63, %v1387_v53  ;;  %v1424_v49 = vrot.slane %v1423_v25, 1  ;;  %v1459_v42 = vadd.f32 %v1458_v43, %v1457_v55  ;;  %v1494_v52 = vrot.slane %v1493_v15, 2  ;;  %p2557_p5 = scmp.ne.s32.totalorder %s4094_s28, %s2556_s14 }
 0x121   : > { %v1407_v10 = vadd.f32 %v1406_v32, %v1405_v59  ;;  %v1442_v37 = vrot.slane %v1441_v47, 1  ;;  %v1477_v41 = vadd.f32 %v1476_v50, %v1475_v54  ;;  %v1512_v3 = vrot.slane %v1511_v23, 2 }
 0x122   : > { %v1425_v20 = vadd.f32 %v1424_v49, %v1423_v25  ;;  %v1460_v6 = vrot.slane %v1459_v42, 1  ;;  %2384 = vlog2.f32 %v1389_v31  ;;  %v1495_v16 = vadd.f32 %v1494_v52, %v1493_v15  ;;  %p2558_p11 = pnand %p2557_p5, %p4644_p4 }
 0x123   : > { %v1443_v57 = vadd.f32 %v1442_v37, %v1441_v47  ;;  %v1478_v48 = vrot.slane %v1477_v41, 1  ;;  %2386 = vlog2.f32 %v1407_v10  ;;  %v1513_v11 = vadd.f32 %v1512_v3, %v1511_v23  ;;  %v4579_v47 = vld [vmem:[#allocation32_spill] sm:$0xff] }
 0x124   : > { %v1461_v27 = vadd.f32 %v1460_v6, %v1459_v42  ;;  %2388 = vlog2.f32 %v1425_v20  ;;  %v1718_v63 = vrot.slane %v3544_v26, 1  ;;  %v1496_v53 = vrot.slane %v1495_v16, 1  ;;  %v591_v37 = vld [vmem:[%s2950_s15 + $0x20] ss:$12 sps:$4 sm:$0xff]   ;;  %v3607_v6 = vld [vmem:[%s2950_s15 + $0x38] ss:$12 sps:$4 sm:$0xff]   ;;  %p2559_p1 = pneg %p2558_p11 }
 0x125   : > { %v1479_v30 = vadd.f32 %v1478_v48, %v1477_v41  ;;  %2390 = vlog2.f32 %v1443_v57  ;;  %v1753_v54 = vadd.f32 %v1752_v29, %v1751_v39  ;;  %v1514_v49 = vrot.slane %v1513_v11, 1  ;;  %v587_v29 = vld [vmem:[%s2950_s15 + $0x8] ss:$12 sps:$4 sm:$0xff]  }
 0x126   : > { %2392 = vlog2.f32 %v1461_v27  ;;  %v1736_v31 = vrot.slane %v3547_v19, 1  ;;  %v3558_v55 = vadd.s32 256, %v4579_v47  ;;  %v1497_v42 = vadd.f32 %v1496_v53, %v1495_v16 }
 0x127   : > { %2394 = vlog2.f32 %v1479_v30  ;;  %v1754_v59 = vrot.slane %v1753_v54, 1  ;;  %v580_v25 = vunpack.c.l.bf16 %v578_v38  ;;  %v1515_v43 = vadd.f32 %v1514_v49, %v1513_v11 }
 0x128   : > { %v4580_v45 = vrot.slane %v3518_v22, 1  ;;  %vm535_vm7 = vcmp.lt.s32.totalorder %v3558_v55, 300  ;;  %v581_v39 = vunpack.c.h.bf16 %v578_v38  ;;  %2396 = vlog2.f32 %v1497_v42 }
 0x129   : > { %v4581_v50 = vrot.slane %v3530_v17, 1  ;;  %v4582_v15 = vrot.slane %v3532_v35, 1  ;;  %vm3582_vm6 = vmand %vm532_vm15, %vm535_vm7  ;;  %v582_v10 = vunpack.c.l.bf16 %v579_v5  ;;  %2398 = vlog2.f32 %v1515_v43  ;;  %v2447_v43 = vld [vmem:[%s2953_s8 + $0x12] sm:$0x3f] }
 0x12a   : > { %v3564_v32 = vadd.f32 %v4580_v45, %v3518_v22  ;;  %v4583_v22 = vmov 0  ;;  %v3596_v52 = vadd.f32 %v1736_v31, %v3547_v19  ;;  %vm3602_vm5 = vmand %vm546_vm0, %vm535_vm7  ;;  %v3609_v3 = vadd.f32 %v1754_v59, %v1753_v54  ;;  %v2445_v31 = vld [vmem:[%s2953_s8 + $0x6] sm:$0x3f]  ;;  %v2446_v59 = vld [vmem:[%s2953_s8 + $0xc] sm:$0x3f] }
 0x12b   : > { %v3571_v16 = vadd.f32 %v4581_v50, %v3530_v17  ;;  %v3576_v23 = vadd.f32 %v4582_v15, %v3532_v35  ;;  %v4584_v22 = vsel %vm3582_vm6, 4294967295, %v4583_v22  ;;  %v4586_v17 = vrot.slane %v3542_v58, 1  ;;  %vm3615_vm14 = vmand %vm547_vm1, %vm535_vm7  ;;  %v2448_v15 = vld [vmem:[%s2953_s8 + $0x18] sm:$0x3f] }
 0x12c   : > { %4585 = vst [vmem:[#allocation24_spill] sm:$0xff] %v4584_v22  ;;  %v3593_v35 = vadd.f32 %v1718_v63, %v3544_v26  ;;  %v3621_v1 = vsel %vm532_vm15, %v580_v25, 0.0  ;;  %v3624_v26 = vld [vmem:[%s2950_s15 + $0x50] ss:$12 sps:$4 sm:$0xff]   ;;  %v604_v19 = vunpack.c.l.bf16 %v587_v29  ;;  %v607_v57 = vunpack.c.h.bf16 %v587_v29  ;;  %vm3630_vm0 = vmand %vm548_vm2, %vm535_vm7  ;;  %s2562_s15 = scalar_lea.vmem %s2561_s7, 768 }
 0x12d   : > { %v3590_v41 = vadd.f32 %v4586_v17, %v3542_v58  ;;  %v3636_v48 = vsel %vm532_vm15, %v581_v39, 0.0  ;;  %v610_v27 = vunpack.c.l.bf16 %v591_v37  ;;  %v613_v11 = vunpack.c.h.bf16 %v591_v37  ;;  %v2444_v63 = vld [vmem:[%s2953_s8] sm:$0x3f]  ;;  %vm3643_vm1 = vmand %vm549_vm3, %vm535_vm7  ;;  %p2564_p6 = scmp.lt.s32.totalorder %s2562_s15, %s2556_s14 }
 0x12e   : > { %v660_v38 = vunpack.c.2.s8 %v2444_v63  ;;  %v3649_v53 = vsel %vm3582_vm6, %v582_v10, 0.0  ;;  %v663_v47 = vunpack.c.2.s8 %v2445_v31  ;;  %v666_v25 = vunpack.c.2.s8 %v2446_v59  ;;  %vm568_vm2 = vmand %vm550_vm4, %vm535_vm7 }
 0x12f   : > { %v669_v45 = vunpack.c.2.s8 %v2447_v43  ;;  %v2385_v39 = vpop.eup %2384  ;;  %v3660_v29 = vsel %vm3602_vm5, %v604_v19, 0.0  ;;  %v3664_v50 = vsel %vm3615_vm14, %v607_v57, 0.0  ;;  %v672_v10 = vunpack.c.2.s8 %v2448_v15  ;;  %v2449_v57 = vld [vmem:[%s2953_s8 + $0x1e] sm:$0x3f]  ;;  %v2450_v43 = vld [vmem:[%s2953_s8 + $0x24] sm:$0x3f]  ;;  %p2565_p3 = por %p2564_p6, %p2563_p2 }
 0x130   : > { %v3667_v37 = vcvt.s32.f32 %v660_v38  ;;  %v2387_v17 = vpop.eup %2386  ;;  %v1525_v63 = vmul.f32 0.6931472, %v2385_v39  ;;  %v3671_v30 = vsel %vm3630_vm0, %v610_v27, 0.0  ;;  %v3675_v20 = vsel %vm3643_vm1, %v613_v11, 0.0  ;;  %v2451_v38 = vld [vmem:[%s2953_s8 + $0x2a] sm:$0x3f] }
 0x131   : > { %v3677_v19 = vcvt.s32.f32 %v663_v47  ;;  %v2389_v58 = vpop.eup %2388  ;;  %v1531_v31 = vmul.f32 0.6931472, %v2387_v17  ;;  %v675_v59 = vunpack.c.2.s8 %v2449_v57  ;;  %v678_v15 = vunpack.c.2.s8 %v2450_v43  ;;  %p2566_p7 = pnand %p2565_p3, %p2559_p1 }
 0x132   : > { %v681_v42 = vunpack.c.2.s8 %v2451_v38  ;;  %v2391_v5 = vpop.eup %2390  ;;  %v1537_v39 = vmul.f32 0.6931472, %v2389_v58  ;;  %v1571_v28 = vadd.f32 %v1525_v63, %v3459_v9  ;;  %v3683_v27 = vcvt.s32.f32 %v666_v25 }
 0x133   : > { %v3685_v49 = vcvt.s32.f32 %v669_v45  ;;  %v2393_v11 = vpop.eup %2392  ;;  %v1543_v40 = vmul.f32 0.6931472, %v2391_v5  ;;  %v1574_v47 = vadd.f32 %v1531_v31, %v3461_v14  ;;  %v3688_v54 = vcvt.s32.f32 %v672_v10 }
 0x134   : > { %v718_v17 = vrot.slane %v3667_v37, 4  ;;  %v2395_v57 = vpop.eup %2394  ;;  %v1549_v43 = vmul.f32 0.6931472, %v2393_v11  ;;  %v1577_v38 = vadd.f32 %v1537_v39, %v3463_v21  ;;  %v1766_v58 = vmul.f32 %v1571_v28, %v3419_v12 }
 0x135   : > { %v736_v9 = vrot.slane %v3677_v19, 4  ;;  %v1555_v25 = vmul.f32 0.6931472, %v2395_v57  ;;  %v1580_v45 = vadd.f32 %v1543_v40, %v3465_v7  ;;  %v1769_v63 = vmul.f32 %v1574_v47, %v3428_v51  ;;  %v2397_v14 = vpop.eup %2396 }
 0x136   : > { %v719_v5 = vadd.f32 %v718_v17, %v3667_v37  ;;  %v1583_v10 = vadd.f32 %v1549_v43, %v3473_v34  ;;  %v1772_v31 = vmul.f32 %v1577_v38, %v3511_v13  ;;  %v1790_v11 = vsub.f32 %v1766_v58, %v3551_v62  ;;  %v2399_v39 = vpop.eup %2398 }
 0x137   : > { %v737_v21 = vadd.f32 %v736_v9, %v3677_v19  ;;  %v1561_v28 = vmul.f32 0.6931472, %v2397_v14  ;;  %v1586_v22 = vadd.f32 %v1555_v25, %v3477_v18  ;;  %v1775_v57 = vmul.f32 %v1580_v45, %v3516_v24 }
 0x138   : > { %v1793_v7 = vsub.f32 %v1769_v63, %v3564_v32  ;;  %v1567_v40 = vmul.f32 0.6931472, %v2399_v39  ;;  %v1778_v47 = vmul.f32 %v1583_v10, %v3523_v8  ;;  %v1796_v17 = vsub.f32 %v1772_v31, %v3571_v16 }
 0x139   : > { %v3706_v34 = vcvt.s32.f32 %v675_v59  ;;  %v1589_v43 = vadd.f32 %v1561_v28, %v3487_v56  ;;  %v1781_v62 = vmul.f32 %v1586_v22, %v3528_v36  ;;  %v1799_v38 = vsub.f32 %v1775_v57, %v3576_v23 }
 0x13a   : > { %v1844_v58 = vsel %vm1102_vm8, %v1793_v7, %v1790_v11  ;;  %v1592_v18 = vadd.f32 %v1567_v40, %v3489_v33  ;;  %v1802_v9 = vsub.f32 %v1778_v47, %v3590_v41  ;;  %v720_v25 = vrot.slane %v719_v5, 2 }
 0x13b   : > { %v1845_v32 = vsel %vm1105_vm9, %v1796_v17, %v1844_v58  ;;  %v1784_v45 = vmul.f32 %v1589_v43, %v3537_v44  ;;  %v1805_v16 = vsub.f32 %v1781_v62, %v3593_v35  ;;  %v738_v56 = vrot.slane %v737_v21, 2 }
 0x13c   : > { %v1846_v59 = vsel %vm1108_vm10, %v1799_v38, %v1845_v32  ;;  %v1787_v22 = vmul.f32 %v1592_v18, %v3540_v61  ;;  %v3720_v63 = vcvt.s32.f32 %v678_v15  ;;  %v754_v33 = vrot.slane %v3683_v27, 4 }
 0x13d   : > { %v1847_v23 = vsel %vm4488_vm11, %v1802_v9, %v1846_v59  ;;  %v1808_v41 = vsub.f32 %v1784_v45, %v3596_v52  ;;  %v3725_v10 = vcvt.s32.f32 %v681_v42  ;;  %v772_v31 = vrot.slane %v3685_v49, 4 }
 0x13e   : > { %v1848_v14 = vsel %vm1114_vm12, %v1805_v16, %v1847_v23  ;;  %v1811_v35 = vsub.f32 %v1787_v22, %v3609_v3  ;;  %v721_v39 = vadd.f32 %v720_v25, %v719_v5  ;;  %v755_v15 = vadd.f32 %v754_v33, %v3683_v27 }
 0x13f   : > { %v790_v28 = vrot.slane %v3688_v54, 4  ;;  %v1849_v52 = vsel %vm4479_vm13, %v1808_v41, %v1848_v14  ;;  %v739_v57 = vadd.f32 %v738_v56, %v737_v21  ;;  %v773_v42 = vadd.f32 %v772_v31, %v3685_v49 }
 0x140   : > { %v808_v7 = vrot.slane %v3706_v34, 4  ;;  %vm4597_vm3 = vcmask 1047559   ;;  %vm4598_vm5 = vcmp.lt.s32.totalorder %v4559_v4, 10  ;;  %v756_v3 = vrot.slane %v755_v15, 2 }
 0x141   : > { %v1850_v40 = vsel %vm4597_vm3, %v1811_v35, %v1849_v52  ;;  %vm571_vm4 = vmand %vm4598_vm5, %vm535_vm7  ;;  %v791_v5 = vadd.f32 %v790_v28, %v3688_v54  ;;  %v826_v47 = vrot.slane %v3720_v63, 4  ;;  %v4599_v17 = vunpack.c.l.bf16 %v3607_v6 }
 0x142   : > { %v1862_v21 = vsel %vm532_vm15, %v1850_v40, 0.0  ;;  %v774_v62 = vrot.slane %v773_v42, 2  ;;  %v809_v38 = vadd.f32 %v808_v7, %v3706_v34  ;;  %v757_v58 = vadd.f32 %v756_v3, %v755_v15 }
 0x143   : > { %v3749_v43 = vsel %vm568_vm2, %v4599_v17, 0.0  ;;  %v792_v18 = vrot.slane %v791_v5, 2  ;;  %v827_v4 = vadd.f32 %v826_v47, %v3720_v63  ;;  %v4600_v9 = vunpack.c.h.bf16 %v3607_v6  ;;  %1868 = vst [vmem:[%s3434_s23 + $0x8] sm:$0xff] %v1862_v21 }
 0x144   : > { %v775_v25 = vadd.f32 %v774_v62, %v773_v42  ;;  %v810_v45 = vrot.slane %v809_v38, 2  ;;  %v844_v16 = vrot.slane %v3725_v10, 4  ;;  %vm4601_vm14 = vcmp.lt.s32.totalorder %v4561_v60, 10 }
 0x145   : > { %v3755_v32 = vsel %vm571_vm4, %v4600_v9, 0.0  ;;  %vm574_vm0 = vmand %vm4601_vm14, %vm535_vm7  ;;  %v722_v59 = vrot.slane %v721_v39, 1  ;;  %v740_v56 = vrot.slane %v739_v57, 1  ;;  %v793_v22 = vadd.f32 %v792_v18, %v791_v5 }
 0x146   : > { %v828_v23 = vrot.slane %v827_v4, 2  ;;  %vm4602_vm1 = vcmp.lt.s32.totalorder %v4565_v2, 10  ;;  %v758_v6 = vrot.slane %v757_v58, 1  ;;  %v811_v33 = vadd.f32 %v810_v45, %v809_v38 }
 0x147   : > { %vm577_vm2 = vmand %vm4602_vm1, %vm535_vm7  ;;  %v845_v41 = vadd.f32 %v844_v16, %v3725_v10  ;;  %v3769_v14 = vsub.f32 0.0, %v3621_v1  ;;  %v776_v31 = vrot.slane %v775_v25, 1  ;;  %v3772_v60 = vsub.f32 0.0, %v3636_v48 }
 0x148   : > { %v829_v35 = vadd.f32 %v828_v23, %v827_v4  ;;  %v3775_v11 = vsub.f32 0.0, %v3649_v53  ;;  %v4603_v55 = vunpack.c.l.bf16 %v3624_v26  ;;  %v794_v2 = vrot.slane %v793_v22, 1  ;;  %v4608_v23 = vld [vmem:[#allocation22_spill] sm:$0xff] }
 0x149   : > { %v812_v28 = vrot.slane %v811_v33, 1  ;;  %v846_v52 = vrot.slane %v845_v41, 2  ;;  %v4604_v42 = vunpack.c.h.bf16 %v3624_v26  ;;  %v3785_v40 = vadd.f32 %v722_v59, %v721_v39 }
 0x14a   : > { %v3779_v15 = vsel %vm574_vm0, %v4603_v55, 0.0  ;;  %v3787_v3 = vadd.f32 %v740_v56, %v739_v57  ;;  %v830_v5 = vrot.slane %v829_v35, 1  ;;  %v3789_v47 = vadd.f32 %v758_v6, %v757_v58 }
 0x14b   : > { %v3783_v7 = vsel %vm577_vm2, %v4604_v42, 0.0  ;;  %v3791_v21 = vadd.f32 %v846_v52, %v845_v41  ;;  %v3795_v38 = vadd.f32 %v776_v31, %v775_v25  ;;  %v886_v18 = vand.u32 2147483647, %v3769_v14 }
 0x14c   : > { %v887_v26 = vand.u32 2147483647, %v3772_v60  ;;  %v888_v39 = vand.u32 2147483647, %v3775_v11  ;;  %v3800_v4 = vadd.f32 %v794_v2, %v793_v22  ;;  %v3802_v57 = vadd.f32 %v812_v28, %v811_v33 }
 0x14d   : > { %v3804_v58 = vadd.f32 %v830_v5, %v829_v35  ;;  %v889_v45 = vsub.f32 0.0, %v886_v18  ;;  %v1174_v25 = vrot.slane %v3660_v29, 4  ;;  %v848_v56 = vrot.slane %v3791_v21, 1 }
 0x14e   : > { %4605 = vst [vmem:[#allocation40_spill] sm:$0xff] %v3800_v4  ;;  %4606 = vst [vmem:[#allocation47_spill] sm:$0xff] %v3802_v57  ;;  %v890_v16 = vsub.f32 0.0, %v887_v26  ;;  %v891_v59 = vsub.f32 0.0, %v888_v39  ;;  %v935_v6 = vsub.s32 0, %v4608_v23  ;;  %v1192_v2 = vrot.slane %v3664_v50, 4 }
 0x14f   : > { %4607 = vst [vmem:[#allocation28_spill] sm:$0xff] %v3804_v58  ;;  %v892_v31 = vmul.f32 1.442695, %v889_v45  ;;  %v1175_v35 = vmax.f32 %v3660_v29, %v1174_v25  ;;  %v1210_v28 = vrot.slane %v3671_v30, 4  ;;  %v1228_v52 = vrot.slane %v3675_v20, 4 }
 0x150   : > { %v894_v33 = vmul.f32 1.442695, %v890_v16  ;;  %v896_v55 = vmul.f32 1.442695, %v891_v59  ;;  %v1246_v42 = vrot.slane %v3749_v43, 4  ;;  %v1264_v18 = vrot.slane %v3755_v32, 4 }
 0x151   : > { %2400 = vpow2.f32 %v892_v31  ;;  %v1176_v5 = vrot.slane %v1175_v35, 2  ;;  %v1282_v26 = vrot.slane %v3779_v15, 4  ;;  %v1193_v39 = vmax.f32 %v3664_v50, %v1192_v2 }
 0x152   : > { %2402 = vpow2.f32 %v894_v33  ;;  %v1211_v45 = vmax.f32 %v3671_v30, %v1210_v28  ;;  %v1229_v16 = vmax.f32 %v3675_v20, %v1228_v52  ;;  %v1247_v25 = vmax.f32 %v3749_v43, %v1246_v42 }
 0x153   : > { %2404 = vpow2.f32 %v896_v55  ;;  %v1177_v59 = vmax.f32 %v1175_v35, %v1176_v5  ;;  %v1265_v9 = vmax.f32 %v3755_v32, %v1264_v18  ;;  %v1194_v62 = vrot.slane %v1193_v39, 2 }
 0x154   : > { %v1212_v31 = vrot.slane %v1211_v45, 2  ;;  %v1230_v17 = vrot.slane %v1229_v16, 2  ;;  %v1283_v22 = vmax.f32 %v3779_v15, %v1282_v26  ;;  %v1248_v61 = vrot.slane %v1247_v25, 2 }
 0x155   : > { %v1178_v41 = vrot.slane %v1177_v59, 1  ;;  %v1266_v33 = vrot.slane %v1265_v9, 2  ;;  %v1300_v2 = vrot.slane %v3783_v7, 4  ;;  %v1195_v44 = vmax.f32 %v1193_v39, %v1194_v62  ;;  %v931_v62 = vld [vmem:[#allocation2] sm:$0x7] }
 0x156   : > { %v1213_v28 = vmax.f32 %v1211_v45, %v1212_v31  ;;  %v1231_v36 = vmax.f32 %v1229_v16, %v1230_v17  ;;  %v1284_v52 = vrot.slane %v1283_v22, 2  ;;  %v1249_v35 = vmax.f32 %v1247_v25, %v1248_v61 }
 0x157   : > { %v3826_v55 = vmax.f32 %v1177_v59, %v1178_v41  ;;  %v1267_v42 = vmax.f32 %v1265_v9, %v1266_v33  ;;  %v1301_v5 = vmax.f32 %v3783_v7, %v1300_v2  ;;  %v1196_v18 = vrot.slane %v1195_v44, 1 }
 0x158   : > { %v1214_v46 = vrot.slane %v1213_v28, 1  ;;  %v1232_v8 = vrot.slane %v1231_v36, 1  ;;  %v1285_v24 = vmax.f32 %v1283_v22, %v1284_v52  ;;  %v1250_v26 = vrot.slane %v1249_v35, 1 }
 0x159   : > { %v1268_v13 = vrot.slane %v1267_v42, 1  ;;  %v1302_v51 = vrot.slane %v1301_v5, 2  ;;  %v1308_v12 = vsub.f32 %v3660_v29, %v3826_v55  ;;  %v3831_v39 = vmax.f32 %v1195_v44, %v1196_v18 }
 0x15a   : > { %v3833_v17 = vmax.f32 %v1213_v28, %v1214_v46  ;;  %v3835_v41 = vmax.f32 %v1231_v36, %v1232_v8  ;;  %v1286_v61 = vrot.slane %v1285_v24, 1  ;;  %v3837_v9 = vmax.f32 %v1249_v35, %v1250_v26 }
 0x15b   : > { %v3839_v45 = vmax.f32 %v1267_v42, %v1268_v13  ;;  %v1303_v16 = vmax.f32 %v1301_v5, %v1302_v51  ;;  %v1334_v22 = vmul.f32 1.442695, %v1308_v12  ;;  %v3842_v59 = vadd.f32 %v848_v56, %v3791_v21 }
 0x15c   : > { %v3844_v25 = vmax.f32 %v1285_v24, %v1286_v61  ;;  %v1311_v44 = vsub.f32 %v3664_v50, %v3831_v39  ;;  %v1314_v46 = vsub.f32 %v3671_v30, %v3833_v17  ;;  %v3850_v8 = vrot.slane %v931_v62, %v935_v6 }
 0x15d   : > { %4609 = vst [vmem:[#allocation29_spill] sm:$0xff] %v3842_v59  ;;  %v1304_v36 = vrot.slane %v1303_v16, 1  ;;  %v1317_v13 = vsub.f32 %v3675_v20, %v3835_v41  ;;  %2406 = vpow2.f32 %v1334_v22  ;;  %v4610_v12 = vsub.s32 1, %v4608_v23 }
 0x15e   : > { %v2401_v51 = vpop.eup %2400  ;;  %v1320_v24 = vsub.f32 %v3749_v43, %v3837_v9  ;;  %v1323_v56 = vsub.f32 %v3755_v32, %v3839_v45  ;;  %v1340_v31 = vmul.f32 1.442695, %v1311_v44  ;;  %v1326_v52 = vsub.f32 %v3779_v15, %v3844_v25 }
 0x15f   : > { %v3856_v21 = vrot.slane %v931_v62, %v4610_v12  ;;  %v2403_v33 = vpop.eup %2402  ;;  %v898_v6 = vadd.f32 1.0, %v2401_v51  ;;  %v901_v2 = vmul.f32 -0.5, %v2401_v51  ;;  %v3862_v28 = vmax.f32 %v1303_v16, %v1304_v36 }
 0x160   : > { %v2405_v35 = vpop.eup %2404  ;;  %v907_v42 = vadd.f32 1.0, %v2403_v33  ;;  %v910_v5 = vmul.f32 -0.5, %v2403_v33  ;;  %2408 = vpow2.f32 %v1340_v31  ;;  %v1346_v18 = vmul.f32 1.442695, %v1314_v46 }
 0x161   : > { %2410 = vlog2.f32 %v898_v6  ;;  %v902_v26 = vadd.f32 1.0, %v901_v2  ;;  %v916_v61 = vadd.f32 1.0, %v2405_v35  ;;  %v1352_v22 = vmul.f32 1.442695, %v1317_v13 }
 0x162   : > { %v904_v12 = vand.u32 2147483647, %v2401_v51  ;;  %2412 = vlog2.f32 %v907_v42  ;;  %v911_v44 = vadd.f32 1.0, %v910_v5  ;;  %v919_v59 = vmul.f32 -0.5, %v2405_v35 }
 0x163   : > { %v913_v58 = vand.u32 2147483647, %v2403_v33  ;;  %2414 = vlog2.f32 %v916_v61  ;;  %v4611_v16 = vsub.s32 2, %v4608_v23  ;;  %v1329_v57 = vsub.f32 %v3783_v7, %v3862_v28 }
 0x164   : > { %v3872_v4 = vmul.f32 %v2401_v51, %v902_v26  ;;  %v922_v46 = vand.u32 2147483647, %v2405_v35  ;;  %2416 = vpow2.f32 %v1346_v18  ;;  %v1358_v31 = vmul.f32 1.442695, %v1320_v24 }
 0x165   : > { %v3868_v36 = vrot.slane %v931_v62, %v4611_v16  ;;  %v3874_v6 = vmul.f32 %v2403_v33, %v911_v44  ;;  %2418 = vpow2.f32 %v1352_v22  ;;  %v1364_v13 = vmul.f32 1.442695, %v1323_v56 }
 0x166   : > { %v1370_v2 = vmul.f32 1.442695, %v1326_v52  ;;  %vm3876_vm7 = vcmp.lt.f32.partialorder %v904_v12, 0.0004427343  ;;  %v920_v23 = vadd.f32 1.0, %v919_v59  ;;  %2420 = vpow2.f32 %v1358_v31 }
 0x167   : > { %v1376_v62 = vmul.f32 1.442695, %v1329_v57  ;;  %v1596_v5 = vmul.f32 %v3667_v37, %v3660_v29  ;;  %vm3882_vm3 = vcmp.lt.f32.partialorder %v913_v58, 0.0004427343  ;;  %2422 = vpow2.f32 %v1364_v13 }
 0x168   : > { %v1599_v24 = vmul.f32 %v3677_v19, %v3664_v50  ;;  %v1602_v56 = vmul.f32 %v3683_v27, %v3671_v30  ;;  %v1605_v33 = vmul.f32 %v3685_v49, %v3675_v20  ;;  %2424 = vpow2.f32 %v1370_v2 }
 0x169   : > { %v1608_v57 = vmul.f32 %v3688_v54, %v3749_v43  ;;  %v1611_v29 = vmul.f32 %v3706_v34, %v3755_v32  ;;  %v1614_v37 = vmul.f32 %v3720_v63, %v3779_v15  ;;  %vm880_vm5 = vcmp.ne.f32.partialorder %v3769_v14, %v3769_v14 }
 0x16a   : > { %vm3900_vm4 = vcmp.lt.f32.partialorder %v922_v46, 0.0004427343  ;;  %2426 = vpow2.f32 %v1376_v62  ;;  %v1630_v30 = vrot.slane %v1596_v5, 4  ;;  %v1648_v49 = vrot.slane %v1599_v24, 4  ;;  %v2407_v20 = vpop.eup %2406 }
 0x16b   : > { %vm881_vm14 = vcmp.ne.f32.partialorder %v3772_v60, %v3772_v60  ;;  %v1666_v54 = vrot.slane %v1602_v56, 4  ;;  %v1684_v19 = vrot.slane %v1605_v33, 4  ;;  %v1702_v27 = vrot.slane %v1608_v57, 4 }
 0x16c   : > { %v1720_v34 = vrot.slane %v1611_v29, 4  ;;  %vm882_vm0 = vcmp.ne.f32.partialorder %v3775_v11, %v3775_v11  ;;  %v1390_v63 = vrot.slane %v2407_v20, 4  ;;  %v1631_v43 = vadd.f32 %v1630_v30, %v1596_v5 }
 0x16d   : > { %v1649_v32 = vadd.f32 %v1648_v49, %v1599_v24  ;;  %v1738_v15 = vrot.slane %v1614_v37, 4  ;;  %v921_v58 = vmul.f32 %v2405_v35, %v920_v23  ;;  %v1667_v59 = vadd.f32 %v1666_v54, %v1602_v56  ;;  %v2409_v26 = vpop.eup %2408 }
 0x16e   : > { %v1685_v52 = vadd.f32 %v1684_v19, %v1605_v33  ;;  %v3908_v18 = vadd.f32 %v1702_v27, %v1608_v57  ;;  %v1391_v61 = vadd.f32 %v2407_v20, %v1390_v63  ;;  %v3912_v22 = vmul.f32 %v3725_v10, %v3783_v7  ;;  %v2411_v16 = vpop.eup %2410 }
 0x16f   : > { %v1632_v12 = vrot.slane %v1631_v43, 2  ;;  %v1650_v44 = vrot.slane %v1649_v32, 2  ;;  %v1408_v46 = vrot.slane %v2409_v26, 4  ;;  %v1668_v31 = vrot.slane %v1667_v59, 2  ;;  %v2413_v35 = vpop.eup %2412 }
 0x170   : > { %v3914_v13 = vadd.f32 %v1720_v34, %v1611_v29  ;;  %v3916_v2 = vadd.f32 %v1738_v15, %v1614_v37  ;;  %v900_v23 = vmul.f32 0.6931472, %v2411_v16  ;;  %v1392_v62 = vrot.slane %v1391_v61, 2  ;;  %v2415_v56 = vpop.eup %2414 }
 0x171   : > { %v1686_v5 = vrot.slane %v1685_v52, 2  ;;  %v1704_v24 = vrot.slane %v3908_v18, 2  ;;  %v909_v33 = vmul.f32 0.6931472, %v2413_v35  ;;  %v1409_v57 = vadd.f32 %v2409_v26, %v1408_v46  ;;  %v2417_v30 = vpop.eup %2416 }
 0x172   : > { %v1633_v10 = vadd.f32 %v1632_v12, %v1631_v43  ;;  %v3919_v7 = vadd.f32 %v1650_v44, %v1649_v32  ;;  %v906_v29 = vsel %vm3876_vm7, %v3872_v4, %v900_v23  ;;  %v918_v49 = vmul.f32 0.6931472, %v2415_v56  ;;  %v2419_v54 = vpop.eup %2418 }
 0x173   : > { %v1393_v37 = vadd.f32 %v1392_v62, %v1391_v61  ;;  %v3924_v20 = vadd.f32 %v1668_v31, %v1667_v59  ;;  %v915_v19 = vsel %vm3882_vm3, %v3874_v6, %v909_v33  ;;  %v4618_v27 = vmax.f32 %v3769_v14, 0.0  ;;  %v2421_v32 = vpop.eup %2420 }
 0x174   : > { %v1410_v63 = vrot.slane %v1409_v57, 2  ;;  %v1426_v43 = vrot.slane %v2417_v30, 4  ;;  %v924_v15 = vsel %vm3900_vm4, %v921_v58, %v918_v49  ;;  %v4619_v4 = vmax.f32 %v3772_v60, 0.0  ;;  %v2423_v61 = vpop.eup %2422 }
 0x175   : > { %v925_v34 = vadd.f32 %v906_v29, %v4618_v27  ;;  %v1394_v26 = vrot.slane %v1393_v37, 1  ;;  %v1444_v59 = vrot.slane %v2419_v54, 4  ;;  %v4620_v12 = vmax.f32 %v3775_v11, 0.0  ;;  %v2425_v46 = vpop.eup %2424 }
 0x176   : > { %v926_v42 = vadd.f32 %v915_v19, %v4619_v4  ;;  %v1411_v51 = vadd.f32 %v1410_v63, %v1409_v57  ;;  %v1427_v16 = vadd.f32 %v2417_v30, %v1426_v43  ;;  %v1634_v31 = vrot.slane %v1633_v10, 1 }
 0x177   : > { %v927_v44 = vadd.f32 %v924_v15, %v4620_v12  ;;  %v928_v6 = vsel %vm880_vm5, %v3769_v14, %v925_v34  ;;  %v1395_v58 = vadd.f32 %v1394_v26, %v1393_v37  ;;  %v1687_v35 = vadd.f32 %v1686_v5, %v1685_v52  ;;  %v2427_v23 = vpop.eup %2426 }
 0x178   : > { %v929_v50 = vsel %vm881_vm14, %v3772_v60, %v926_v42  ;;  %v3950_v56 = vmul.f32 %v3850_v8, %v928_v6  ;;  %v3953_v14 = vadd.f32 %v928_v6, %v3621_v1  ;;  %v1412_v33 = vrot.slane %v1411_v51, 1 }
 0x179   : > { %v930_v62 = vsel %vm882_vm0, %v3775_v11, %v927_v44  ;;  %v3956_v57 = vmul.f32 %v3856_v21, %v929_v50  ;;  %v3959_v60 = vadd.f32 %v929_v50, %v3636_v48  ;;  %v1428_v52 = vrot.slane %v1427_v16, 2 }
 0x17a   : > { %v1445_v5 = vadd.f32 %v2419_v54, %v1444_v59  ;;  %v1413_v30 = vadd.f32 %v1412_v33, %v1411_v51  ;;  %v1462_v29 = vrot.slane %v2421_v32, 4  ;;  %v1480_v49 = vrot.slane %v2423_v61, 4 }
 0x17b   : > { %v1498_v37 = vrot.slane %v2425_v46, 4  ;;  %v1429_v11 = vadd.f32 %v1428_v52, %v1427_v16  ;;  %v1516_v8 = vrot.slane %v2427_v23, 4  ;;  %2428 = vlog2.f32 %v1395_v58 }
 0x17c   : > { %v1446_v19 = vrot.slane %v1445_v5, 2  ;;  %v1463_v27 = vadd.f32 %v2421_v32, %v1462_v29  ;;  %v1481_v1 = vadd.f32 %v2423_v61, %v1480_v49  ;;  %2430 = vlog2.f32 %v1413_v30 }
 0x17d   : > { %v1499_v34 = vadd.f32 %v2425_v46, %v1498_v37  ;;  %v3962_v21 = vmul.f32 %v3868_v36, %v930_v62  ;;  %v1430_v63 = vrot.slane %v1429_v11, 1  ;;  %v1517_v43 = vadd.f32 %v2427_v23, %v1516_v8 }
 0x17e   : > { %v1447_v48 = vadd.f32 %v1446_v19, %v1445_v5  ;;  %v3965_v54 = vadd.f32 %v930_v62, %v3649_v53  ;;  %v1464_v15 = vrot.slane %v1463_v27, 2  ;;  %v1482_v4 = vrot.slane %v1481_v1, 2 }
 0x17f   : > { %v1500_v42 = vrot.slane %v1499_v34, 2  ;;  %v1431_v26 = vadd.f32 %v1430_v63, %v1429_v11  ;;  %v1518_v12 = vrot.slane %v1517_v43, 2  ;;  %v3967_v44 = vadd.f32 %v1634_v31, %v1633_v10 }
 0x180   : > { %v1448_v59 = vrot.slane %v1447_v48, 1  ;;  %v1465_v32 = vadd.f32 %v1464_v15, %v1463_v27  ;;  %v1483_v61 = vadd.f32 %v1482_v4, %v1481_v1  ;;  %v1652_v36 = vrot.slane %v3919_v7, 1  ;;  %v4623_v15 = vld [vmem:[#allocation39_spill] sm:$0xff] }
 0x181   : > { %v1501_v6 = vadd.f32 %v1500_v42, %v1499_v34  ;;  %v1519_v16 = vadd.f32 %v1518_v12, %v1517_v43  ;;  %2432 = vlog2.f32 %v1431_v26  ;;  %v1670_v46 = vrot.slane %v3924_v20, 1  ;;  %v4621_v34 = vld [vmem:[#allocation41_spill] sm:$0xff]  ;;  %v4624_v42 = vld [vmem:[#allocation43_spill] sm:$0xff]  ;;  %v4625_v26 = vld [vmem:[#allocation44_spill] sm:$0xff] }
 0x182   : > { %v1449_v51 = vadd.f32 %v1448_v59, %v1447_v48  ;;  %v1466_v53 = vrot.slane %v1465_v32, 1  ;;  %v1484_v50 = vrot.slane %v1483_v61, 1  ;;  %v1688_v23 = vrot.slane %v1687_v35, 1  ;;  %v4626_v12 = vld [vmem:[#allocation45_spill] sm:$0xff] }
 0x183   : > { %v1502_v58 = vrot.slane %v1501_v6, 1  ;;  %v1520_v62 = vrot.slane %v1519_v16, 1  ;;  %v1705_v10 = vadd.f32 %v1704_v24, %v3908_v18  ;;  %v1722_v31 = vrot.slane %v3914_v13, 2 }
 0x184   : > { %2434 = vlog2.f32 %v1449_v51  ;;  %v1467_v33 = vadd.f32 %v1466_v53, %v1465_v32  ;;  %v1485_v52 = vadd.f32 %v1484_v50, %v1483_v61  ;;  %v1653_v30 = vadd.f32 %v1652_v36, %v3919_v7  ;;  %v4627_v32 = vld [vmem:[#allocation46_spill] sm:$0xff] }
 0x185   : > { %v1503_v5 = vadd.f32 %v1502_v58, %v1501_v6  ;;  %v1521_v29 = vadd.f32 %v1520_v62, %v1519_v16  ;;  %v1706_v49 = vrot.slane %v1705_v10, 1  ;;  %v1723_v37 = vadd.f32 %v1722_v31, %v3914_v13 }
 0x186   : > { %v1740_v11 = vrot.slane %v3916_v2, 2  ;;  %2436 = vlog2.f32 %v1467_v33  ;;  %v3979_v19 = vadd.f32 %v1670_v46, %v3924_v20  ;;  %v3981_v8 = vadd.f32 %v1688_v23, %v1687_v35  ;;  %v4622_v20 = vld [vmem:[#allocation42_spill] sm:$0xff] }
 0x187   : > { %v1756_v18 = vrot.slane %v3912_v22, 4  ;;  %2438 = vlog2.f32 %v1485_v52  ;;  %v3984_v24 = vadd.f32 %v1706_v49, %v1705_v10  ;;  %v1724_v27 = vrot.slane %v1723_v37, 1 }
 0x188   : > { %v1741_v7 = vadd.f32 %v1740_v11, %v3916_v2  ;;  %vm4477_vm1 = vcmp.gt.f32.partialorder %v4553_v0, 0.0  ;;  %v2429_v1 = vpop.eup %2428  ;;  %2440 = vlog2.f32 %v1503_v5  ;;  %vm4476_vm2 = vcmp.gt.f32.partialorder %v4621_v34, 0.0 }
 0x189   : > { %v1757_v13 = vadd.f32 %v1756_v18, %v3912_v22  ;;  %vm4475_vm7 = vcmp.gt.f32.partialorder %v4622_v20, 0.0  ;;  %v2431_v35 = vpop.eup %2430  ;;  %v1527_v63 = vmul.f32 0.6931472, %v2429_v1  ;;  %2442 = vlog2.f32 %v1521_v29 }
 0x18a   : > { %v3991_v48 = vadd.f32 %v1724_v27, %v1723_v37  ;;  %v1742_v43 = vrot.slane %v1741_v7, 1  ;;  %vm4478_vm3 = vcmp.gt.f32.partialorder %v4623_v15, 0.0  ;;  %v1533_v4 = vmul.f32 0.6931472, %v2431_v35 }
 0x18b   : > { %v1758_v2 = vrot.slane %v1757_v13, 2  ;;  %vm4474_vm5 = vcmp.gt.f32.partialorder %v4624_v42, 0.0  ;;  %vm4473_vm4 = vcmp.gt.f32.partialorder %v4625_v26, 0.0  ;;  %v1572_v22 = vadd.f32 %v1527_v63, %v3826_v55 }
 0x18c   : > { %v3997_v59 = vadd.f32 %v1742_v43, %v1741_v7  ;;  %vm4472_vm14 = vcmp.gt.f32.partialorder %v4626_v12, 0.0  ;;  %vm4471_vm0 = vcmp.gt.f32.partialorder %v4627_v32, 0.0  ;;  %v1575_v61 = vadd.f32 %v1533_v4, %v3831_v39 }
 0x18d   : > { %v1759_v6 = vadd.f32 %v1758_v2, %v1757_v13  ;;  %v957_v36 = vrot.slane %v3950_v56, 1  ;;  %v960_v51 = vrot.slane %v3950_v56, 2  ;;  %v1767_v16 = vmul.f32 %v1572_v22, %v3785_v40 }
 0x18e   : > { %v963_v46 = vrot.slane %v3950_v56, 3  ;;  %v966_v53 = vrot.slane %v3950_v56, 4  ;;  %v969_v55 = vrot.slane %v3950_v56, 5  ;;  %v2433_v50 = vpop.eup %2432  ;;  %v1770_v23 = vmul.f32 %v1575_v61, %v3787_v3 }
 0x18f   : > { %v1760_v58 = vrot.slane %v1759_v6, 1  ;;  %v972_v62 = vrot.slane %v3950_v56, 6  ;;  %v975_v39 = vrot.slane %v3950_v56, 7  ;;  %v1539_v10 = vmul.f32 0.6931472, %v2433_v50 }
 0x190   : > { %v1791_v31 = vsub.f32 %v1767_v16, %v3967_v44  ;;  %v1005_v33 = vrot.slane %v3953_v14, 1  ;;  %v1008_v52 = vrot.slane %v3953_v14, 2  ;;  %v1794_v49 = vsub.f32 %v1770_v23, %v1653_v30 }
 0x191   : > { %v2435_v5 = vpop.eup %2434  ;;  %v4014_v29 = vadd.f32 %v1760_v58, %v1759_v6  ;;  %v1011_v37 = vrot.slane %v3953_v14, 3  ;;  %v1014_v11 = vrot.slane %v3953_v14, 4  ;;  %v1578_v27 = vadd.f32 %v1539_v10, %v3833_v17 }
 0x192   : > { %v1545_v18 = vmul.f32 0.6931472, %v2435_v5  ;;  %v1017_v7 = vrot.slane %v3953_v14, 5  ;;  %v1020_v1 = vrot.slane %v3953_v14, 6  ;;  %v1851_v44 = vsel %vm1102_vm8, %v1794_v49, %v1791_v31  ;;  %v4628_v5 = vld [vmem:[#allocation40_spill] sm:$0xff] }
 0x193   : > { %v1023_v13 = vrot.slane %v3953_v14, 7  ;;  %v1050_v30 = vsel %vm4478_vm3, %v3950_v56, %v3953_v14  ;;  %v1053_v35 = vsel %vm4477_vm1, %v957_v36, %v1005_v33  ;;  %v2437_v63 = vpop.eup %2436  ;;  %v1773_v17 = vmul.f32 %v1578_v27, %v3789_v47 }
 0x194   : > { %v1581_v43 = vadd.f32 %v1545_v18, %v3835_v41  ;;  %v1056_v4 = vsel %vm4476_vm2, %v960_v51, %v1008_v52  ;;  %v1059_v2 = vsel %vm4475_vm7, %v963_v46, %v1011_v37  ;;  %v2439_v22 = vpop.eup %2438  ;;  %v1551_v61 = vmul.f32 0.6931472, %v2437_v63 }
 0x195   : > { %v1062_v6 = vsel %vm4474_vm5, %v966_v53, %v1014_v11  ;;  %v1065_v56 = vsel %vm4473_vm4, %v969_v55, %v1017_v7  ;;  %v1068_v14 = vsel %vm4472_vm14, %v972_v62, %v1020_v1  ;;  %v2441_v41 = vpop.eup %2440  ;;  %v1557_v36 = vmul.f32 0.6931472, %v2439_v22  ;;  %v4629_v11 = vld [vmem:[#allocation47_spill] sm:$0xff] }
 0x196   : > { %v1776_v16 = vmul.f32 %v1581_v43, %v3795_v38  ;;  %v1797_v51 = vsub.f32 %v1773_v17, %v3979_v19  ;;  %v1071_v46 = vsel %vm4471_vm0, %v975_v39, %v1023_v13  ;;  %v2443_v50 = vpop.eup %2442  ;;  %v1563_v58 = vmul.f32 0.6931472, %v2441_v41  ;;  %v4637_v41 = vld [vmem:[#allocation36_spill] sm:$0xff] }
 0x197   : > { %v1584_v23 = vadd.f32 %v1551_v61, %v3837_v9  ;;  %v1101_v53 = vrot.slane %v1053_v35, 7  ;;  %v1104_v10 = vrot.slane %v1056_v4, 6  ;;  %v1569_v31 = vmul.f32 0.6931472, %v2443_v50  ;;  %v4632_v61 = vld [vmem:[#allocation33_spill] sm:$0xff] }
 0x198   : > { %v1587_v55 = vadd.f32 %v1557_v36, %v3839_v45  ;;  %v1800_v62 = vsub.f32 %v1776_v16, %v3981_v8  ;;  %v1852_v33 = vsel %vm1105_vm9, %v1797_v51, %v1851_v44  ;;  %v1590_v52 = vadd.f32 %v1563_v58, %v3844_v25  ;;  %v4630_v45 = vld [vmem:[#allocation28_spill] sm:$0xff]  ;;  %v4631_v44 = vld [vmem:[#allocation29_spill] sm:$0xff]  ;;  %v4641_v58 = vld [vmem:[#allocation38_spill] sm:$0xff] }
 0x199   : > { %v1779_v19 = vmul.f32 %v1584_v23, %v4628_v5  ;;  %v1103_v49 = vsel %vm1102_vm8, %v1101_v53, %v1050_v30  ;;  %v1107_v39 = vrot.slane %v1059_v2, 5  ;;  %v1593_v37 = vadd.f32 %v1569_v31, %v3862_v28  ;;  %v4638_v36 = vld [vmem:[#allocation37_spill] sm:$0xff]  ;;  %v4642_v23 = vld [vmem:[#allocation27_spill] sm:$0xff] }
 0x19a   : > { %v1782_v9 = vmul.f32 %v1587_v55, %v4629_v11  ;;  %v1853_v18 = vsel %vm1108_vm10, %v1800_v62, %v1852_v33  ;;  %v1106_v27 = vsel %vm1105_vm9, %v1104_v10, %v1103_v49  ;;  %v1785_v7 = vmul.f32 %v1590_v52, %v4630_v45  ;;  %v4643_v53 = vld [vmem:[#allocation23_spill] sm:$0xff] }
 0x19b   : > { %v1803_v8 = vsub.f32 %v1779_v19, %v3984_v24  ;;  %v1109_v25 = vsel %vm1108_vm10, %v1107_v39, %v1106_v27  ;;  %v1110_v1 = vrot.slane %v1062_v6, 4  ;;  %v1788_v13 = vmul.f32 %v1593_v37, %v4631_v44  ;;  %v4633_v6 = vld [vmem:[#allocation34_spill] sm:$0xff] }
 0x19c   : > { %v1806_v30 = vsub.f32 %v1782_v9, %v3991_v48  ;;  %v1113_v28 = vrot.slane %v1065_v56, 3  ;;  %v1116_v35 = vrot.slane %v1068_v14, 2  ;;  %v1809_v63 = vsub.f32 %v1785_v7, %v3997_v59  ;;  %v4634_v56 = vld [vmem:[#allocation35_spill] sm:$0xff] }
 0x19d   : > { %v1854_v43 = vsel %vm4488_vm11, %v1803_v8, %v1853_v18  ;;  %v1112_v17 = vsel %vm4488_vm11, %v1110_v1, %v1109_v25  ;;  %v1119_v4 = vrot.slane %v1071_v46, 1  ;;  %v1812_v2 = vsub.f32 %v1788_v13, %v4014_v29 }
 0x19e   : > { %v1855_v24 = vsel %vm1114_vm12, %v1806_v30, %v1854_v43  ;;  %v1115_v22 = vsel %vm1114_vm12, %v1113_v28, %v1112_v17  ;;  %vm4487_vm0 = vcmp.gt.f32.partialorder %v4632_v61, 0.0  ;;  %vm4486_vm14 = vcmp.gt.f32.partialorder %v4633_v6, 0.0 }
 0x19f   : > { %v1856_v48 = vsel %vm4479_vm13, %v1809_v63, %v1855_v24  ;;  %v1118_v59 = vsel %vm4479_vm13, %v1116_v35, %v1115_v22  ;;  %vm4485_vm4 = vcmp.gt.f32.partialorder %v4634_v56, 0.0  ;;  %vm4635_vm5 = vcmask 1047559  }
 0x1a0   : > { %v1857_v29 = vsel %vm4635_vm5, %v1812_v2, %v1856_v48  ;;  %vm4636_vm7 = vmmov %vm4635_vm5  ;;  %vm4484_vm2 = vcmp.gt.f32.partialorder %v4637_v41, 0.0  ;;  %vm4480_vm1 = vcmp.gt.f32.partialorder %v4638_v36, 0.0  ;;  %vm4481_vm3 = vcmp.gt.f32.partialorder %v4641_v58, 0.0 }
 0x1a1   : > { %v1121_v14 = vsel %vm4636_vm7, %v1119_v4, %v1118_v59  ;;  %v1863_v51 = vsel %vm3582_vm6, %v1857_v29, 0.0  ;;  %vm4482_vm13 = vcmp.gt.f32.partialorder %v4642_v23, 0.0  ;;  %vm4483_vm5 = vcmp.gt.f32.partialorder %v4643_v53, 0.0 }
 0x1a2   : > { %v1153_v50 = vsel %vm532_vm15, %v1121_v14, 0.0  ;;  %v958_v10 = vrot.slane %v3956_v57, 1  ;;  %v961_v31 = vrot.slane %v3956_v57, 2  ;;  %v964_v55 = vrot.slane %v3956_v57, 3  ;;  %1869 = vst [vmem:[%s3434_s23 + $0x10] sm:$0xff] %v1863_v51 }
 0x1a3   : > { %v967_v62 = vrot.slane %v3956_v57, 4  ;;  %v970_v33 = vrot.slane %v3956_v57, 5  ;;  %1159 = vst [vmem:[%s4102_s30] sm:$0xff] %v1153_v50  ;;  %v973_v52 = vrot.slane %v3956_v57, 6  ;;  %v976_v19 = vrot.slane %v3956_v57, 7 }
 0x1a4   : > { %v1006_v49 = vrot.slane %v3959_v60, 1  ;;  %v1009_v39 = vrot.slane %v3959_v60, 2  ;;  %v1012_v37 = vrot.slane %v3959_v60, 3  ;;  %v1015_v9 = vrot.slane %v3959_v60, 4 }
 0x1a5   : > { %v1018_v18 = vrot.slane %v3959_v60, 5  ;;  %v1021_v27 = vrot.slane %v3959_v60, 6 }
 0x1a6   : > { %2569 = shalt.err (!%p2566_p7)
}
 0x1a7   : > { %s2570_s27 = scalar_lea.hbm %s4092_s16, 384  ;;  %s2574_s8 = scalar_lea.hbm %s4400_s5, 768 }
 0x1a8   : > { %p2571_p10 = scmp.ne.s32.totalorder %s4092_s16, %s2570_s27  ;;  %p2575_p8 = scmp.lt.s32.totalorder %s4092_s16, %s4400_s5 }
 0x1a9   : > { %p2576_p12 = scmp.lt.s32.totalorder %s2574_s8, %s2570_s27 }
 0x1aa   : > { %p2572_p13 = pnand %p2571_p10, %p4644_p4 }
 0x1ab   : > { %p2577_p0 = por %p2576_p12, %p2575_p8 }
 0x1ac   : > { %p2573_p9 = pneg %p2572_p13 }
 0x1ae   : > { %p2578_p5 = pnand %p2577_p0, %p2573_p9 }
 0x1b0   : > { %2581 = shalt.err (!%p2578_p5)
}
 0x1b1   : > { %2259 = dma.vmem_to_hbm [thread:$0]  (%p4644_p4), %s4094_s28, 384, %s4092_s16, %s4115_s0   ;;  %v1024_v7 = vrot.slane %v3959_v60, 7  ;;  %v1051_v8 = vsel %vm4487_vm0, %v3956_v57, %v3959_v60  ;;  %v1054_v25 = vsel %vm4486_vm14, %v958_v10, %v1006_v49  ;;  %v1057_v1 = vsel %vm4485_vm4, %v961_v31, %v1009_v39 }
 0x1b2   : > { %v1060_v13 = vsel %vm4484_vm2, %v964_v55, %v1012_v37  ;;  %v1063_v30 = vsel %vm4480_vm1, %v967_v62, %v1015_v9  ;;  %v1066_v28 = vsel %vm4481_vm3, %v970_v33, %v1018_v18  ;;  %v1069_v35 = vsel %vm4482_vm13, %v973_v52, %v1021_v27  ;;  %s1960_s28 = sshll.u32 %s4102_s30, 4  ;;  %s4270_s16 = scalar_lea.hbm %s4399_s4, %s4069_s17  ;;  %s4272_s28 = int_to_ptr.vmem [resolvable:$true] %s1960_s28 }
 0x1b3   : > { %v1072_v57 = vsel %vm4483_vm5, %v976_v19, %v1024_v7  ;;  %v1122_v60 = vrot.slane %v1054_v25, 7  ;;  %v1124_v63 = vrot.slane %v1057_v1, 6  ;;  %v1126_v43 = vrot.slane %v1060_v13, 5  ;;  %s2582_s14 = scalar_lea.vmem %s4272_s28, 384  ;;  %s2712_s13 = smov [#allocation10]  }
 0x1b4   : > { %v1128_v17 = vrot.slane %v1063_v30, 4  ;;  %v1130_v4 = vrot.slane %v1066_v28, 3  ;;  %v1132_v2 = vrot.slane %v1069_v35, 2  ;;  %v1134_v24 = vrot.slane %v1072_v57, 1  ;;  %p2583_p11 = scmp.ne.s32.totalorder %s4272_s28, %s2582_s14  ;;  %s2586_s7 = sshll.u32 %s2712_s13, 4  ;;  %s2587_s7 = int_to_ptr.vmem [resolvable:$false] %s2586_s7 }
 0x1b5   : > { %v1123_v22 = vsel %vm1102_vm8, %v1122_v60, %v1051_v8  ;;  %vm852_vm7 = vcmp.gt.f32.partialorder %v3785_v40, 0.0  ;;  %vm855_vm1 = vcmp.gt.f32.partialorder %v3787_v3, 0.0  ;;  %vm858_vm3 = vcmp.gt.f32.partialorder %v3789_v47, 0.0  ;;  %s2588_s15 = scalar_lea.vmem %s2587_s7, 768  ;;  %p2589_p6 = scmp.lt.s32.totalorder %s4272_s28, %s2587_s7 }
 0x1b6   : > { %v1125_v48 = vsel %vm1105_vm9, %v1124_v63, %v1123_v22  ;;  %vm861_vm13 = vcmp.gt.f32.partialorder %v3795_v38, 0.0  ;;  %vm4492_vm5 = vcmp.gt.f32.partialorder %v4628_v5, 0.0  ;;  %vm4491_vm2 = vcmp.gt.f32.partialorder %v4629_v11, 0.0  ;;  %p2584_p1 = pnand %p2583_p11, %p4644_p4  ;;  %p2590_p3 = scmp.lt.s32.totalorder %s2588_s15, %s2582_s14 }
 0x1b7   : > { %v1127_v59 = vsel %vm1108_vm10, %v1126_v43, %v1125_v48  ;;  %vm4490_vm4 = vcmp.gt.f32.partialorder %v4630_v45, 0.0  ;;  %vm4489_vm14 = vcmp.gt.f32.partialorder %v4631_v44, 0.0  ;;  %v959_v29 = vrot.slane %v3962_v21, 1 }
 0x1b8   : > { %v1129_v14 = vsel %vm4488_vm11, %v1128_v17, %v1127_v59  ;;  %v962_v51 = vrot.slane %v3962_v21, 2  ;;  %v965_v50 = vrot.slane %v3962_v21, 3  ;;  %v968_v10 = vrot.slane %v3962_v21, 4  ;;  %p2585_p2 = pneg %p2584_p1  ;;  %p2591_p7 = por %p2590_p3, %p2589_p6 }
 0x1b9   : > { %v1131_v31 = vsel %vm1114_vm12, %v1130_v4, %v1129_v14  ;;  %v971_v55 = vrot.slane %v3962_v21, 5  ;;  %v974_v62 = vrot.slane %v3962_v21, 6  ;;  %v977_v33 = vrot.slane %v3962_v21, 7 }
 0x1ba   : > { %vm4645_vm0 = vcmask 1046534   ;;  %v1007_v19 = vrot.slane %v3965_v54, 1  ;;  %v1010_v49 = vrot.slane %v3965_v54, 2  ;;  %v1013_v39 = vrot.slane %v3965_v54, 3  ;;  %p2592_p10 = pnand %p2591_p7, %p2585_p2 }
 0x1bb   : > { %v1133_v52 = vsel %vm4645_vm0, %v1132_v2, %v1131_v31  ;;  %vm4646_vm11 = vcmask 1047559   ;;  %v1016_v9 = vrot.slane %v3965_v54, 4  ;;  %v1019_v18 = vrot.slane %v3965_v54, 5 }
 0x1bc   : > { %v1135_v37 = vsel %vm4646_vm11, %v1134_v24, %v1133_v52  ;;  %v1022_v27 = vrot.slane %v3965_v54, 6  ;;  %v1025_v8 = vrot.slane %v3965_v54, 7  ;;  %v1052_v25 = vsel %vm852_vm7, %v3962_v21, %v3965_v54 }
 0x1bd   : > { %v1154_v7 = vsel %vm532_vm15, %v1135_v37, 0.0  ;;  %v1055_v1 = vsel %vm855_vm1, %v959_v29, %v1007_v19  ;;  %v1058_v13 = vsel %vm858_vm3, %v962_v51, %v1010_v49  ;;  %v1061_v30 = vsel %vm861_vm13, %v965_v50, %v1013_v39 }
 0x1be   : > { %v1064_v28 = vsel %vm4492_vm5, %v968_v10, %v1016_v9  ;;  %v1067_v35 = vsel %vm4491_vm2, %v971_v55, %v1019_v18  ;;  %v1070_v57 = vsel %vm4490_vm4, %v974_v62, %v1022_v27  ;;  %v1136_v60 = vrot.slane %v1055_v1, 7  ;;  %1160 = vst [vmem:[%s4102_s30 + $0x8] sm:$0xff] %v1154_v7 }
 0x1bf   : > { %v1073_v21 = vsel %vm4489_vm14, %v977_v33, %v1025_v8  ;;  %v1138_v54 = vrot.slane %v1058_v13, 6  ;;  %v1140_v63 = vrot.slane %v1061_v30, 5  ;;  %v1142_v43 = vrot.slane %v1064_v28, 4 }
 0x1c0   : > { %v1137_v17 = vsel %vm1102_vm8, %v1136_v60, %v1052_v25  ;;  %v1144_v4 = vrot.slane %v1067_v35, 3  ;;  %v1146_v2 = vrot.slane %v1070_v57, 2  ;;  %v2711_v22 = vmov 0  }
 0x1c1   : > { %v1139_v24 = vsel %vm1105_vm9, %v1138_v54, %v1137_v17  ;;  %vm4647_vm11 = vcmp.gt.f32.partialorder %v4623_v15, 0.0  ;;  %vm4648_vm0 = vcmp.gt.f32.partialorder %v4553_v0, 0.0  ;;  %vm4649_vm14 = vcmp.gt.f32.partialorder %v4621_v34, 0.0 }
 0x1c2   : > { %v1873_v48 = vsel %vm4647_vm11, 1, %v2711_v22  ;;  %v1876_v59 = vsel %vm4648_vm0, 1, %v2711_v22  ;;  %v1879_v29 = vsel %vm4649_vm14, 1, %v2711_v22  ;;  %v1141_v14 = vsel %vm1108_vm10, %v1140_v63, %v1139_v24 }
 0x1c3   : > { %v1148_v51 = vrot.slane %v1073_v21, 1  ;;  %vm4650_vm4 = vcmp.gt.f32.partialorder %v4622_v20, 0.0  ;;  %vm4651_vm2 = vcmask 1044484   ;;  %vm4652_vm11 = vcmp.gt.f32.partialorder %v4624_v42, 0.0 }
 0x1c4   : > { %v1882_v50 = vsel %vm4650_vm4, 1, %v2711_v22  ;;  %v1143_v10 = vsel %vm4651_vm2, %v1142_v43, %v1141_v14  ;;  %v1885_v15 = vsel %vm4652_vm11, 1, %v2711_v22  ;;  %v1897_v0 = vsel %vm1102_vm8, %v1876_v59, %v1873_v48 }
 0x1c5   : > { %v1145_v31 = vsel %vm1114_vm12, %v1144_v4, %v1143_v10  ;;  %vm4653_vm14 = vcmp.gt.f32.partialorder %v4625_v26, 0.0  ;;  %vm4654_vm0 = vcmp.gt.f32.partialorder %v4626_v12, 0.0  ;;  %v1898_v20 = vsel %vm1105_vm9, %v1879_v29, %v1897_v0 }
 0x1c6   : > { %v1888_v34 = vsel %vm4653_vm14, 1, %v2711_v22  ;;  %v1891_v55 = vsel %vm4654_vm0, 1, %v2711_v22  ;;  %vm4655_vm4 = vcmask 1046534   ;;  %v1899_v42 = vsel %vm1108_vm10, %v1882_v50, %v1898_v20 }
 0x1c7   : > { %v1147_v62 = vsel %vm4655_vm4, %v1146_v2, %v1145_v31  ;;  %vm4656_vm2 = vcmp.gt.f32.partialorder %v4632_v61, 0.0  ;;  %vm4657_vm11 = vcmp.gt.f32.partialorder %v4633_v6, 0.0  ;;  %vm4658_vm14 = vcmask 1047559  }
 0x1c8   : > { %v1874_v33 = vsel %vm4656_vm2, 1, %v2711_v22  ;;  %v1877_v26 = vsel %vm4657_vm11, 1, %v2711_v22  ;;  %v1149_v52 = vsel %vm4658_vm14, %v1148_v51, %v1147_v62  ;;  %vm4659_vm0 = vcmp.gt.f32.partialorder %v4627_v32, 0.0 }
 0x1c9   : > { %v1894_v12 = vsel %vm4659_vm0, 1, %v2711_v22  ;;  %vm4660_vm5 = vcmask 1044484   ;;  %vm4661_vm4 = vcmp.gt.f32.partialorder %v4634_v56, 0.0  ;;  %v1155_v61 = vsel %vm3582_vm6, %v1149_v52, 0.0 }
 0x1ca   : > { %v1900_v19 = vsel %vm4660_vm5, %v1885_v15, %v1899_v42  ;;  %v1880_v49 = vsel %vm4661_vm4, 1, %v2711_v22  ;;  %vm4662_vm2 = vcmp.gt.f32.partialorder %v4637_v41, 0.0  ;;  %vm4663_vm11 = vcmp.gt.f32.partialorder %v4638_v36, 0.0  ;;  %1161 = vst [vmem:[%s4102_s30 + $0x10] sm:$0xff] %v1155_v61  ;;  %s1934_s30 = scalar_lea.sflag [#allocation4], %s2937_s19 }
 0x1cb   : > { %v1901_v6 = vsel %vm1114_vm12, %v1888_v34, %v1900_v19  ;;  %v1883_v39 = vsel %vm4662_vm2, 1, %v2711_v22  ;;  %v1886_v32 = vsel %vm4663_vm11, 1, %v2711_v22  ;;  %vm4664_vm14 = vcmask 1046534  }
 0x1cc   : > { %v1902_v37 = vsel %vm4664_vm14, %v1891_v55, %v1901_v6  ;;  %vm4665_vm5 = vcmp.gt.f32.partialorder %v4641_v58, 0.0  ;;  %v1904_v9 = vsel %vm1102_vm8, %v1877_v26, %v1874_v33  ;;  %vm4666_vm0 = vcmask 1047559  }
 0x1cd   : > { %v1889_v56 = vsel %vm4665_vm5, 1, %v2711_v22  ;;  %v1903_v41 = vsel %vm4666_vm0, %v1894_v12, %v1902_v37  ;;  %v1905_v36 = vsel %vm1105_vm9, %v1880_v49, %v1904_v9  ;;  %v1875_v58 = vsel %vm852_vm7, 1, %v2711_v22 }
 0x1ce   : > { %v1878_v18 = vsel %vm855_vm1, 1, %v2711_v22  ;;  %vm1918_vm4 = vcmp.ne.s32.totalorder %v1903_v41, 0  ;;  %vm4667_vm2 = vcmp.gt.f32.partialorder %v4642_v23, 0.0  ;;  %v1906_v7 = vsel %vm1108_vm10, %v1883_v39, %v1905_v36 }
 0x1cf   : > { %v1892_v27 = vsel %vm4667_vm2, 1, %v2711_v22  ;;  %v1881_v8 = vsel %vm858_vm3, 1, %v2711_v22  ;;  %vm4292_vm7 = vmand %vm532_vm15, %vm1918_vm4  ;;  %vm4670_vm1 = vcmp.gt.f32.partialorder %v4643_v53, 0.0  ;;  %vm4671_vm11 = vcmask 1044484  }
 0x1d0   : > { %v1895_v3 = vsel %vm4670_vm1, 1, %v2711_v22  ;;  %v1907_v23 = vsel %vm4671_vm11, %v1886_v32, %v1906_v7  ;;  %v1884_v25 = vsel %vm861_vm13, 1, %v2711_v22 }
 0x1d1   : > { %2595 = shalt.err (!%p2592_p10)
}
 0x1d2   : > { %s2596_s27 = scalar_lea.hbm %s4270_s16, 384  ;;  %s2600_s20 = scalar_lea.hbm %s4399_s4, 768 }
 0x1d3   : > { %p2597_p13 = scmp.ne.s32.totalorder %s4270_s16, %s2596_s27  ;;  %p2601_p12 = scmp.lt.s32.totalorder %s4270_s16, %s4399_s4 }
 0x1d4   : > { %p2602_p0 = scmp.lt.s32.totalorder %s2600_s20, %s2596_s27 }
 0x1d5   : > { %p2598_p9 = pnand %p2597_p13, %p4644_p4 }
 0x1d6   : > { %p2603_p5 = por %p2602_p0, %p2601_p12 }
 0x1d7   : > { %p2599_p8 = pneg %p2598_p9 }
 0x1d9   : > { %p2604_p11 = pnand %p2603_p5, %p2599_p8 }
 0x1db   : > { %2607 = shalt.err (!%p2604_p11)
}
 0x1dc   : > { %2258 = dma.vmem_to_hbm [thread:$0]  (%p4644_p4), %s4272_s28, 384, %s4270_s16, %s1934_s30   ;;  %v2713_v47 = vmov 0.0   ;;  %v1908_v53 = vsel %vm1114_vm12, %v1889_v56, %v1907_v23  ;;  %vm4672_vm13 = vcmp.gt.f32.partialorder %v4628_v5, 0.0  ;;  %v1911_v13 = vsel %vm1102_vm8, %v1878_v18, %v1875_v58  ;;  %vm4673_vm3 = vmmov %vm4664_vm14 }
 0x1dd   : > { %v1924_v38 = vsel %vm4292_vm7, 1.0, %v2713_v47  ;;  %v1887_v1 = vsel %vm4672_vm13, 1, %v2711_v22  ;;  %v1909_v30 = vsel %vm4673_vm3, %v1892_v27, %v1908_v53  ;;  %vm4674_vm14 = vcmp.gt.f32.partialorder %v4629_v11, 0.0  ;;  %vm4675_vm5 = vmmov %vm4666_vm0  ;;  %s472_s23 = scalar_lea.vmem [#allocation13], %s3382_s9  ;;  %s1990_s11 = scalar_lea.hbm %s4401_s6, %s4069_s17 }
 0x1de   : > { %v1890_v28 = vsel %vm4674_vm14, 1, %v2711_v22  ;;  %v1912_v35 = vsel %vm1105_vm9, %v1881_v8, %v1911_v13  ;;  %v1910_v57 = vsel %vm4675_vm5, %v1895_v3, %v1909_v30  ;;  %vm4676_vm0 = vcmp.gt.f32.partialorder %v4630_v45, 0.0  ;;  %1930 = vst [vmem:[%s472_s23] sm:$0xff] %v1924_v38  ;;  %vm4678_vm2 = vmmov %vm4671_vm11  ;;  %s1992_s9 = sshll.u32 %s472_s23, 4  ;;  %s2714_s30 = smov [#allocation13]   ;;  %s1993_s9 = int_to_ptr.vmem [resolvable:$true] %s1992_s9 }
 0x1df   : > { %v1893_v60 = vsel %vm4676_vm0, 1, %v2711_v22  ;;  %v1913_v21 = vsel %vm1108_vm10, %v1884_v25, %v1912_v35  ;;  %vm1919_vm8 = vcmp.ne.s32.totalorder %v1910_v57, 0  ;;  %vm4677_vm4 = vcmp.gt.f32.partialorder %v4631_v44, 0.0  ;;  %vm4679_vm7 = vmmov %vm4673_vm3  ;;  %s2608_s16 = scalar_lea.vmem %s1993_s9, 384  ;;  %s2612_s14 = sshll.u32 %s2714_s30, 4  ;;  %s2613_s14 = int_to_ptr.vmem [resolvable:$false] %s2612_s14 }
 0x1e0   : > { %v1896_v5 = vsel %vm4677_vm4, 1, %v2711_v22  ;;  %v1914_v11 = vsel %vm4678_vm2, %v1887_v1, %v1913_v21  ;;  %vm1922_vm9 = vmand %vm532_vm15, %vm1919_vm8  ;;  %p2609_p1 = scmp.ne.s32.totalorder %s1993_s9, %s2608_s16  ;;  %s2614_s13 = scalar_lea.vmem %s2613_s14, 768 }
 0x1e1   : > { %v1915_v54 = vsel %vm1114_vm12, %v1890_v28, %v1914_v11  ;;  %v1925_v45 = vsel %vm1922_vm9, 1.0, %v2713_v47  ;;  %vm4680_vm10 = vmmov %vm4675_vm5  ;;  %p2615_p3 = scmp.lt.s32.totalorder %s1993_s9, %s2613_s14  ;;  %p2616_p7 = scmp.lt.s32.totalorder %s2614_s13, %s2608_s16 }
 0x1e2   : > { %v1916_v63 = vsel %vm4679_vm7, %v1893_v60, %v1915_v54  ;;  %1931 = vst [vmem:[%s472_s23 + $0x8] sm:$0xff] %v1925_v45  ;;  %p2610_p2 = pnand %p2609_p1, %p4644_p4 }
 0x1e3   : > { %v1917_v43 = vsel %vm4680_vm10, %v1896_v5, %v1916_v63  ;;  %p2617_p10 = por %p2616_p7, %p2615_p3 }
 0x1e4   : > { %vm1920_vm1 = vcmp.ne.s32.totalorder %v1917_v43, 0  ;;  %p2611_p6 = pneg %p2610_p2 }
 0x1e5   : > { %vm1923_vm11 = vmand %vm3582_vm6, %vm1920_vm1 }
 0x1e6   : > { %v1926_v44 = vsel %vm1923_vm11, 1.0, %v2713_v47  ;;  %p2618_p13 = pnand %p2617_p10, %p2611_p6 }
 0x1e7   : > { %1932 = vst [vmem:[%s472_s23 + $0x10] sm:$0xff] %v1926_v44 }
 0x1e8   : > { %2621 = shalt.err (!%p2618_p13)
}
 0x1e9   : > { %s2622_s7 = scalar_lea.hbm %s1990_s11, 384  ;;  %s2626_s27 = scalar_lea.hbm %s4401_s6, 768 }
 0x1ea   : > { %p2623_p9 = scmp.ne.s32.totalorder %s1990_s11, %s2622_s7  ;;  %p2627_p0 = scmp.lt.s32.totalorder %s1990_s11, %s4401_s6 }
 0x1eb   : > { %p2628_p5 = scmp.lt.s32.totalorder %s2626_s27, %s2622_s7 }
 0x1ec   : > { %p2624_p8 = pnand %p2623_p9, %p4644_p4 }
 0x1ed   : > { %p2629_p11 = por %p2628_p5, %p2627_p0 }
 0x1ee   : > { %p2625_p12 = pneg %p2624_p8 }
 0x1f0   : > { %p2630_p1 = pnand %p2629_p11, %p2625_p12 }
 0x1f2   : > { %2633 = shalt.err (!%p2630_p1)
}
 0x1f3   : > { %2260 = dma.vmem_to_hbm [thread:$0]  (%p4644_p4), %s1993_s9, 384, %s1990_s11, %s4115_s0  }
 0x1f4 PF: > { %s2004_s20 = sand.u32 1, %s2680_s21   ;;  %p4681_p2 = scmp.ne.s32.totalorder %s4500_s12, 0 }
 0x1f5   : > { %p4682_p6 = scmp.ge.s32.totalorder %s2700_s26, 2  ;;  %s2005_s8 = scalar_lea.sflag [#allocation4], %s2004_s20 }
 0x1f7   : > { %p2269_p3 = pnand %p4682_p6, %p4681_p2 }
 0x1f9   : > { %p2270_p7 = pneg %p2269_p3 }
 0x1fb   : > { %2671 = dma.done.wait (%p2270_p7), %s2005_s8, 384  }
 0x1fc   : > { %2673 = vsyncadd (%p2270_p7), %s2005_s8, 4294966912  ;;  %s4683_s29 = sadd.s32 4294967294, %s2700_s26  }
 0x1fd   : > { %s2013_s23 = sand.u32 1, %s4683_s29  }
 0x1fe   : > { %s2014_s28 = scalar_lea.sflag [#allocation12], %s2013_s23 }
 0x1ff   : > { %2675 = dma.done.wait (%p2270_p7), %s2014_s28, 768  }
 0x200   : > { %2677 = vsyncadd (%p2270_p7), %s2014_s28, 4294966528  ;;  %s30_s26 = sadd.s32 1, %s2700_s26   ;;  %s4684_s10 = sld [smem:[#allocation19_spill]] }
 0x201   : > { %p27_p4 = scmp.ge.s32.totalorder %s30_s26, 4   ;;  %s4685_s23 = sld [smem:[#allocation21_spill]] }
 0x202   : > { %s4686_s12 = sld [smem:[#allocation20_spill]]  ;;  %s4687_s21 = smov %s2684_s22 }
 0x203   : > { %s4689_s24 = smov %s2696_s25 }
 0x204   :  { %29 = sbr.rel (!%p27_p4) target bundleno = 13 (0xd), region = 147 }
 0x206   : > { %s4688_s22 = smov %s4684_s10 }
 0x208   : > { %s4690_s25 = smov %s4686_s12 }
 0x209   :  { %2028 = vsyncpa [#allocation3], 1 }
 0x20a   :  { %2030 = vsyncpa [#allocation3 + $0x1], 1 }
 0x20b   :  { %2031 = vsyncpa [#allocation6], 1 }
 0x20c   :  { %2033 = vsyncpa [#allocation6 + $0x1], 1 }
 0x20d   :  { %2034 = vsyncpa [#allocation9], 1 }
 0x20e   :  { %2036 = vsyncpa [#allocation9 + $0x1], 1 }
 0x20f   :  { %2037 = vsyncpa [#allocation4], 1 }
 0x210   :  { %2039 = vsyncpa [#allocation4 + $0x1], 1 }
 0x211   :  { %2040 = vsyncpa [#allocation12], 1 }
 0x212   :  { %2042 = vsyncpa [#allocation12 + $0x1], 1 }

</bundles_post_ra>
